<compile_context>
chip_gen: v7x
topology: tpu7x:2x2x1
jax: 0.10.0
libtpu: 0.0.40
codegen_flags: <defaults>
</compile_context>

<pallas_src>
import jax
import jax.numpy as jnp
import numpy as np
from jax.experimental import pallas as pl
from jax.experimental.pallas import tpu as pltpu

# ---- small instance of LOCAL_CNN_SMALL_Q_v2 (grid__size=10, input_size=2, output_size=16) ----
GRID = 10
C_IN = 2
N_ACT = 16
C1 = 32                       # conv1 out channels
C2 = 32                       # conv2 out channels
K = 2                         # locally-connected kernel size
OH1 = (GRID - 2) // 1 + 1     # 9
OH2 = (OH1 - 2) // 2 + 1      # 4
PH = OH2 // 2                 # 2 (after MaxPool2d(2, stride=2))
FLAT = C2 * PH * PH           # 128
HID = 128
TAPS = K * K                  # 4 conv1 taps per conv2 output position
NP2 = OH2 * OH2               # 16 conv2 output positions
FEAT1 = C_IN * K * K          # 8 conv1 patch features
OUT_LANES = 128               # lane-dense packed output width
MAX_TB = 512                  # batch rows per grid step (~2-3 MiB/step incl. weights,
                              # far under scoped VMEM on v5e/v6e/v7x)
F32_MIN = float(jnp.finfo(jnp.float32).min)


def _round_up(n, m):
    return ((n + m - 1) // m) * m


def _position_tables():
    """Pool-group-major conv2 positions and conv2-patch-major conv1 positions."""
    i2, j2 = [], []
    for pi in range(PH):
        for pj in range(PH):
            for di in range(2):
                for dj in range(2):
                    i2.append(2 * pi + di)
                    j2.append(2 * pj + dj)
    i1, j1 = [], []
    for a, b in zip(i2, j2):
        for ki in range(K):
            for kj in range(K):
                i1.append(2 * a + ki)
                j1.append(2 * b + kj)
    return (np.asarray(i2), np.asarray(j2), np.asarray(i1), np.asarray(j1))


_I2, _J2, _I1, _J1 = _position_tables()


# ----------------------------------------------------------------------------- kernel
def _lcn_q_kernel(p1_ref, w1_ref, b1_ref, w2_ref, b2_ref,
                  wcat_ref, bcat_ref, wq_ref, bq_ref, out_ref):
    f32 = jnp.float32
    bf16 = jnp.bfloat16
    tb = out_ref.shape[0]

    # Fused conv1 -> relu -> conv2 -> relu -> running MaxPool over the 16 conv2
    # positions (pool-group-major).  conv2 weight columns are pre-placed at lane
    # offset 32*pool_group, so the running max over all positions directly yields
    # the lane-dense (TB, 128) flattened pooled activations (relu makes everything
    # >= 0, lanes outside a position's group are exactly 0).
    packed = jnp.zeros((tb, FLAT), f32)
    for p2 in range(NP2):
        h1 = jnp.dot(p1_ref[p2], w1_ref[p2], preferred_element_type=f32)   # (TB,128)
        h1 = jnp.maximum(h1 + b1_ref[p2], 0.0)
        h2 = jnp.dot(h1.astype(bf16), w2_ref[p2], preferred_element_type=f32)  # (TB,128)
        h2 = jnp.maximum(h2 + b2_ref[p2], 0.0)
        packed = jnp.maximum(packed, h2)

    # Dueling head, both first layers fused into one K=128 MXU contraction.
    hc = jnp.dot(packed.astype(bf16), wcat_ref[...], preferred_element_type=f32)
    hc = jnp.maximum(hc + bcat_ref[...], 0.0)                               # (TB,256)

    # Both second layers + the dueling combine (value + adv - adv.mean) folded into
    # one matmul: lanes [0,N_ACT) = q_pred (= masked_q, all-true mask), lane N_ACT
    # = value, remaining lanes 0.  Single lane-dense store.
    head = jnp.dot(hc.astype(bf16), wq_ref[...], preferred_element_type=f32)
    out_ref[...] = head + bq_ref[...]


# ----------------------------------------------------------------------------- param repack (one-time)
def prepare_params(params):
    """Repack PyTorch-layout parameters into kernel layout (bf16 MXU operands)."""
    (w1, b1, w2, b2, W1, bL1, W2, bL2, Wv1, bv1, Wv2, bv2) = params
    f32 = jnp.float32
    bf16 = jnp.bfloat16

    # conv1: (C1, C_IN, OH1, OH1, K*K) -> per conv2-patch block-diagonal weight
    # (NP2, TAPS*FEAT1, TAPS*C1); bias -> (NP2, 1, TAPS*C1).
    w1pos = jnp.transpose(w1, (2, 3, 1, 4, 0))[_I1, _J1]          # (64, C_IN, 4, C1)
    w1pos = w1pos.reshape(NP2, TAPS, FEAT1, C1).astype(f32)
    w1blk = jnp.zeros((NP2, TAPS, FEAT1, TAPS, C1), f32)
    for kk in range(TAPS):
        w1blk = w1blk.at[:, kk, :, kk, :].set(w1pos[:, kk])
    w1blk = w1blk.reshape(NP2, TAPS * FEAT1, TAPS * C1).astype(bf16)   # (16, 32, 128)
    b1cat = jnp.transpose(b1, (1, 2, 0))[_I1, _J1].reshape(NP2, 1, TAPS * C1).astype(f32)

    # conv2: (C2, C1, OH2, OH2, K*K) -> (NP2, TAPS*C1, FLAT) with the 32 output
    # columns of position p2 placed at lane offset 32*(p2 // TAPS) (its pool group).
    w2pos = jnp.transpose(w2, (2, 3, 4, 1, 0))[_I2, _J2]          # (16, 4, C1, C2)
    w2r = w2pos.reshape(NP2, TAPS * C1, C2).astype(f32)
    b2r = jnp.transpose(b2, (1, 2, 0))[_I2, _J2].reshape(NP2, C2).astype(f32)
    w2g = jnp.zeros((NP2, TAPS * C1, FLAT), f32)
    b2g = jnp.zeros((NP2, 1, FLAT), f32)
    for p2 in range(NP2):
        g = p2 // TAPS
        w2g = w2g.at[p2, :, g * C2:(g + 1) * C2].set(w2r[p2])
        b2g = b2g.at[p2, 0, g * C2:(g + 1) * C2].set(b2r[p2])
    w2g = w2g.astype(bf16)                                        # (16, 128, 128)

    # dueling head, first layers fused.  Torch flatten feature index is
    # c*PH*PH + g; kernel (packed) feature index is g*C2 + c -> permute rows.
    def permute_head(Wm):
        Wt = Wm.T.reshape(C2, PH * PH, Wm.shape[0])
        return jnp.transpose(Wt, (1, 0, 2)).reshape(FLAT, Wm.shape[0])

    wcat = jnp.concatenate([permute_head(W1), permute_head(Wv1)], axis=1)
    wcat = wcat.astype(f32).astype(bf16)                          # (128, 256)
    bcat = jnp.concatenate([bL1, bv1]).reshape(1, 2 * HID).astype(f32)

    # second layers + dueling combine fused: head = hc @ wq + bq gives
    # q_pred = value + adv - mean(adv) in lanes [0,N_ACT) and value in lane N_ACT.
    W2t = W2.T.astype(f32)                                        # (HID, N_ACT)
    Wv2t = Wv2.T.astype(f32)                                      # (HID, 1)
    wq = jnp.zeros((2 * HID, OUT_LANES), f32)
    wq = wq.at[:HID, :N_ACT].set(W2t - jnp.mean(W2t, axis=1, keepdims=True))
    wq = wq.at[HID:, :N_ACT].set(jnp.broadcast_to(Wv2t, (HID, N_ACT)))
    wq = wq.at[HID:, N_ACT:N_ACT + 1].set(Wv2t)
    wq = wq.astype(bf16)
    bq = jnp.zeros((1, OUT_LANES), f32)
    bq = bq.at[0, :N_ACT].set(bL2 - jnp.mean(bL2) + bv2[0])
    bq = bq.at[0, N_ACT].set(bv2[0])

    return (w1blk, b1cat, w2g, b2g, wcat, bcat, wq, bq)


# ----------------------------------------------------------------------------- forward
@jax.jit
def local_cnn_small_q_v2_forward(x, kparams):
    (w1blk, b1cat, w2g, b2g, wcat, bcat, wq, bq) = kparams
    if x.ndim == 3:
        x = x[None]                                               # matches x.unsqueeze(0)
    B = x.shape[0]

    # batch tiling: multiple of 16 sublanes (bf16 tile), and >= 2 grid steps for
    # large B so v7x's two TensorCores both get work on the "parallel" axis.
    TB = min(MAX_TB, _round_up(pl.cdiv(B, 2), 16))
    Bp = _round_up(B, TB)
    nb = Bp // TB

    # conv1 patches in bf16, gathered only at the 64 positions conv2 reads,
    # conv2-patch-major: p1[p2, b, tap*FEAT1 + c*4 + k].
    xb = x.astype(jnp.bfloat16)
    cols = [xb[:, c, ki:ki + OH1, kj:kj + OH1]
            for c in range(C_IN) for ki in range(K) for kj in range(K)]
    pat = jnp.stack(cols, axis=-1)                                # (B, OH1, OH1, 8)
    p1 = pat[:, _I1, _J1, :]                                      # (B, 64, 8)
    p1 = p1.reshape(B, NP2, TAPS * FEAT1)                         # (B, 16, 32)
    p1 = jnp.transpose(p1, (1, 0, 2))                             # (16, B, 32)
    if Bp != B:
        p1 = jnp.pad(p1, ((0, 0), (0, Bp - B), (0, 0)))

    # TODO(synk): Q_Mask.filter source not provided; with forbidden=[] it is an
    # all-True action mask, so masked_q == q_pred and no mask input is needed.

    in_specs = [
        pl.BlockSpec((NP2, TB, TAPS * FEAT1), lambda i: (0, i, 0)),   # p1 (batch-tiled)
        pl.BlockSpec(w1blk.shape, lambda i: (0, 0, 0)),               # VMEM-resident weights
        pl.BlockSpec(b1cat.shape, lambda i: (0, 0, 0)),
        pl.BlockSpec(w2g.shape, lambda i: (0, 0, 0)),
        pl.BlockSpec(b2g.shape, lambda i: (0, 0, 0)),
        pl.BlockSpec(wcat.shape, lambda i: (0, 0)),
        pl.BlockSpec(bcat.shape, lambda i: (0, 0)),
        pl.BlockSpec(wq.shape, lambda i: (0, 0)),
        pl.BlockSpec(bq.shape, lambda i: (0, 0)),
    ]
    out_spec = pl.BlockSpec((TB, OUT_LANES), lambda i: (i, 0))

    mm_flops = 2 * (NP2 * (TAPS * FEAT1) * FLAT       # conv1 (block-diag, all taps)
                    + NP2 * FLAT * FLAT               # conv2 (group-offset columns)
                    + FLAT * 2 * HID                  # fused head layer 1
                    + 2 * HID * OUT_LANES)            # fused head layer 2 + dueling
    weight_bytes = 2 * (w1blk.size + w2g.size + wcat.size + wq.size) \
        + 4 * (b1cat.size + b2g.size + bcat.size + bq.size)
    cost = pl.CostEstimate(
        flops=Bp * mm_flops, transcendentals=0,
        bytes_accessed=Bp * (NP2 * TAPS * FEAT1 * 2 + OUT_LANES * 4) + weight_bytes)

    out = pl.pallas_call(
        _lcn_q_kernel,
        grid=(nb,),
        in_specs=in_specs,
        out_specs=out_spec,
        out_shape=jax.ShapeDtypeStruct((Bp, OUT_LANES), jnp.float32),
        compiler_params=pltpu.CompilerParams(
            dimension_semantics=("parallel",)),
        cost_estimate=cost,
    )(p1, w1blk, b1cat, w2g, b2g, wcat, bcat, wq, bq)

    masked_q = out[:B, :N_ACT]
    value_pred = out[:B, N_ACT:N_ACT + 1]
    return masked_q, value_pred


# ----------------------------------------------------------------------------- params / reference
def init_params(key):
    ks = jax.random.split(key, 12)

    def u(k, shape, fan_in):
        bound = 1.0 / np.sqrt(fan_in)
        return jax.random.uniform(k, shape, jnp.float32, -bound, bound)

    w1 = u(ks[0], (C1, C_IN, OH1, OH1, K * K), C_IN * K * K)
    b1 = u(ks[1], (C1, OH1, OH1), C_IN * K * K)
    w2 = u(ks[2], (C2, C1, OH2, OH2, K * K), C1 * K * K)
    b2 = u(ks[3], (C2, OH2, OH2), C1 * K * K)
    W1 = u(ks[4], (HID, FLAT), FLAT);   bL1 = u(ks[5], (HID,), FLAT)
    W2 = u(ks[6], (N_ACT, HID), HID);   bL2 = u(ks[7], (N_ACT,), HID)
    Wv1 = u(ks[8], (HID, FLAT), FLAT);  bv1 = u(ks[9], (HID,), FLAT)
    Wv2 = u(ks[10], (1, HID), HID);     bv2 = u(ks[11], (1,), HID)
    return (w1, b1, w2, b2, W1, bL1, W2, bL2, Wv1, bv1, Wv2, bv2)


def ref_forward(x, params):
    # pure-JAX f32 mirror of the PyTorch forward (NCHW), for correctness check
    (w1, b1, w2, b2, W1, bL1, W2, bL2, Wv1, bv1, Wv2, bv2) = params
    hp = jax.lax.Precision.HIGHEST
    if x.ndim == 3:
        x = x[None]

    def lc(xin, w, b, k, s):
        Bn, C, H, Wd = xin.shape
        OH = (H - k) // s + 1
        OW = (Wd - k) // s + 1
        pats = jnp.stack([xin[:, :, ki:ki + s * (OH - 1) + 1:s, kj:kj + s * (OW - 1) + 1:s]
                          for ki in range(k) for kj in range(k)], axis=-1)   # (B,C,OH,OW,k*k)
        return jnp.einsum('bcijk,ocijk->boij', pats, w, precision=hp) + b[None]

    h1 = jax.nn.relu(lc(x, w1, b1, 2, 1))
    h2 = jax.nn.relu(lc(h1, w2, b2, 2, 2))
    Bn, Cc, Hh, Ww = h2.shape
    f1 = h2.reshape(Bn, Cc, Hh // 2, 2, Ww // 2, 2).max(axis=(3, 5))
    m = f1.reshape(Bn, -1)
    h3 = jax.nn.relu(jnp.dot(m, W1.T, precision=hp) + bL1)
    adv = jnp.dot(h3, W2.T, precision=hp) + bL2
    hv = jax.nn.relu(jnp.dot(m, Wv1.T, precision=hp) + bv1)
    value = jnp.dot(hv, Wv2.T, precision=hp) + bv2
    q = value + (adv - adv.mean(axis=1, keepdims=True))
    mask = jnp.ones_like(q, dtype=bool)        # Q_Mask with forbidden=[] -> all True
    return jnp.where(mask, q, F32_MIN), value


if __name__ == "__main__":
    key = jax.random.PRNGKey(0)
    kp, kx = jax.random.split(key)
    params = init_params(kp)
    kparams = prepare_params(params)          # one-time repack into kernel layout
    x = jax.random.normal(kx, (2, C_IN, GRID, GRID), jnp.float32)

    masked_q, value_pred = jax.block_until_ready(
        local_cnn_small_q_v2_forward(x, kparams))

    rq, rv = ref_forward(x, params)
    np.testing.assert_allclose(np.asarray(masked_q), np.asarray(rq), rtol=2e-2, atol=2e-2)
    np.testing.assert_allclose(np.asarray(value_pred), np.asarray(rv), rtol=2e-2, atol=2e-2)
    print("KERNEL_OK")
</pallas_src>

<mosaic_0001>
module attributes {stable_mosaic.version = 11 : i64} {
  func.func @_lcn_q_kernel(%arg0: i32, %arg1: memref<16x16x32xbf16, #tpu.memory_space<vmem>>, %arg2: memref<16x32x128xbf16, #tpu.memory_space<vmem>>, %arg3: memref<16x1x128xf32, #tpu.memory_space<vmem>>, %arg4: memref<16x128x128xbf16, #tpu.memory_space<vmem>>, %arg5: memref<16x1x128xf32, #tpu.memory_space<vmem>>, %arg6: memref<128x256xbf16, #tpu.memory_space<vmem>>, %arg7: memref<1x256xf32, #tpu.memory_space<vmem>>, %arg8: memref<256x128xbf16, #tpu.memory_space<vmem>>, %arg9: memref<1x128xf32, #tpu.memory_space<vmem>>, %arg10: memref<16x128xf32, #tpu.memory_space<vmem>>) attributes {dimension_semantics = [#tpu.dimension_semantics<parallel>], iteration_bounds = array<i64: 1>, scalar_prefetch = 0 : i64, scratch_operands = 0 : i64, tpu.core_type = #tpu.core_type<tc>, window_params = [{transform_indices = @transform_0, window_bounds = array<i64: 16, 16, 32>}, {pipeline_mode = #tpu.pipeline_mode<synchronous>, transform_indices = @transform_1, window_bounds = array<i64: 16, 32, 128>}, {pipeline_mode = #tpu.pipeline_mode<synchronous>, transform_indices = @transform_2, window_bounds = array<i64: 16, 1, 128>}, {pipeline_mode = #tpu.pipeline_mode<synchronous>, transform_indices = @transform_3, window_bounds = array<i64: 16, 128, 128>}, {pipeline_mode = #tpu.pipeline_mode<synchronous>, transform_indices = @transform_4, window_bounds = array<i64: 16, 1, 128>}, {pipeline_mode = #tpu.pipeline_mode<synchronous>, transform_indices = @transform_5, window_bounds = array<i64: 128, 256>}, {pipeline_mode = #tpu.pipeline_mode<synchronous>, transform_indices = @transform_6, window_bounds = array<i64: 1, 256>}, {pipeline_mode = #tpu.pipeline_mode<synchronous>, transform_indices = @transform_7, window_bounds = array<i64: 256, 128>}, {pipeline_mode = #tpu.pipeline_mode<synchronous>, transform_indices = @transform_8, window_bounds = array<i64: 1, 128>}, {transform_indices = @transform_9, window_bounds = array<i64: 16, 128>}]} {
    %cst = arith.constant 0.000000e+00 : f32
    %0 = vector.broadcast %cst : f32 to vector<16x128xf32>
    %c0 = arith.constant 0 : index
    %c0_0 = arith.constant 0 : index
    %c0_1 = arith.constant 0 : index
    %1 = vector.load %arg1[%c0, %c0_0, %c0_1] : memref<16x16x32xbf16, #tpu.memory_space<vmem>>, vector<1x16x32xbf16>
    %2 = vector.shape_cast %1 : vector<1x16x32xbf16> to vector<16x32xbf16>
    %c0_2 = arith.constant 0 : index
    %c0_3 = arith.constant 0 : index
    %c0_4 = arith.constant 0 : index
    %3 = vector.load %arg2[%c0_2, %c0_3, %c0_4] : memref<16x32x128xbf16, #tpu.memory_space<vmem>>, vector<1x32x128xbf16>
    %4 = vector.shape_cast %3 : vector<1x32x128xbf16> to vector<32x128xbf16>
    %cst_5 = arith.constant dense<0.000000e+00> : vector<16x128xf32>
    %5 = tpu.matmul %2, %4, %cst_5 {dimension_numbers = #tpu.dot_dimension_numbers<[1], [0], [0], [1], [0, 0, 1, 1], [], []>} : vector<16x32xbf16>, vector<32x128xbf16>, vector<16x128xf32> -> vector<16x128xf32>
    %c0_6 = arith.constant 0 : index
    %c0_7 = arith.constant 0 : index
    %c0_8 = arith.constant 0 : index
    %6 = vector.load %arg3[%c0_6, %c0_7, %c0_8] : memref<16x1x128xf32, #tpu.memory_space<vmem>>, vector<1x1x128xf32>
    %7 = vector.shape_cast %6 : vector<1x1x128xf32> to vector<1x128xf32>
    %8 = vector.broadcast %7 : vector<1x128xf32> to vector<16x128xf32>
    %9 = arith.addf %5, %8 : vector<16x128xf32>
    %cst_9 = arith.constant 0.000000e+00 : f32
    %10 = vector.broadcast %cst_9 : f32 to vector<16x128xf32>
    %11 = arith.maximumf %9, %10 : vector<16x128xf32>
    %12 = arith.truncf %11 : vector<16x128xf32> to vector<16x128xbf16>
    %c0_10 = arith.constant 0 : index
    %c0_11 = arith.constant 0 : index
    %c0_12 = arith.constant 0 : index
    %13 = vector.load %arg4[%c0_10, %c0_11, %c0_12] : memref<16x128x128xbf16, #tpu.memory_space<vmem>>, vector<1x128x128xbf16>
    %14 = vector.shape_cast %13 : vector<1x128x128xbf16> to vector<128x128xbf16>
    %cst_13 = arith.constant dense<0.000000e+00> : vector<16x128xf32>
    %15 = tpu.matmul %12, %14, %cst_13 {dimension_numbers = #tpu.dot_dimension_numbers<[1], [0], [0], [1], [0, 0, 1, 1], [], []>} : vector<16x128xbf16>, vector<128x128xbf16>, vector<16x128xf32> -> vector<16x128xf32>
    %c0_14 = arith.constant 0 : index
    %c0_15 = arith.constant 0 : index
    %c0_16 = arith.constant 0 : index
    %16 = vector.load %arg5[%c0_14, %c0_15, %c0_16] : memref<16x1x128xf32, #tpu.memory_space<vmem>>, vector<1x1x128xf32>
    %17 = vector.shape_cast %16 : vector<1x1x128xf32> to vector<1x128xf32>
    %18 = vector.broadcast %17 : vector<1x128xf32> to vector<16x128xf32>
    %19 = arith.addf %15, %18 : vector<16x128xf32>
    %cst_17 = arith.constant 0.000000e+00 : f32
    %20 = vector.broadcast %cst_17 : f32 to vector<16x128xf32>
    %21 = arith.maximumf %19, %20 : vector<16x128xf32>
    %22 = arith.maximumf %0, %21 : vector<16x128xf32>
    %c1 = arith.constant 1 : index
    %c0_18 = arith.constant 0 : index
    %c0_19 = arith.constant 0 : index
    %23 = vector.load %arg1[%c1, %c0_18, %c0_19] : memref<16x16x32xbf16, #tpu.memory_space<vmem>>, vector<1x16x32xbf16>
    %24 = vector.shape_cast %23 : vector<1x16x32xbf16> to vector<16x32xbf16>
    %c1_20 = arith.constant 1 : index
    %c0_21 = arith.constant 0 : index
    %c0_22 = arith.constant 0 : index
    %25 = vector.load %arg2[%c1_20, %c0_21, %c0_22] : memref<16x32x128xbf16, #tpu.memory_space<vmem>>, vector<1x32x128xbf16>
    %26 = vector.shape_cast %25 : vector<1x32x128xbf16> to vector<32x128xbf16>
    %cst_23 = arith.constant dense<0.000000e+00> : vector<16x128xf32>
    %27 = tpu.matmul %24, %26, %cst_23 {dimension_numbers = #tpu.dot_dimension_numbers<[1], [0], [0], [1], [0, 0, 1, 1], [], []>} : vector<16x32xbf16>, vector<32x128xbf16>, vector<16x128xf32> -> vector<16x128xf32>
    %c1_24 = arith.constant 1 : index
    %c0_25 = arith.constant 0 : index
    %c0_26 = arith.constant 0 : index
    %28 = vector.load %arg3[%c1_24, %c0_25, %c0_26] : memref<16x1x128xf32, #tpu.memory_space<vmem>>, vector<1x1x128xf32>
    %29 = vector.shape_cast %28 : vector<1x1x128xf32> to vector<1x128xf32>
    %30 = vector.broadcast %29 : vector<1x128xf32> to vector<16x128xf32>
    %31 = arith.addf %27, %30 : vector<16x128xf32>
    %cst_27 = arith.constant 0.000000e+00 : f32
    %32 = vector.broadcast %cst_27 : f32 to vector<16x128xf32>
    %33 = arith.maximumf %31, %32 : vector<16x128xf32>
    %34 = arith.truncf %33 : vector<16x128xf32> to vector<16x128xbf16>
    %c1_28 = arith.constant 1 : index
    %c0_29 = arith.constant 0 : index
    %c0_30 = arith.constant 0 : index
    %35 = vector.load %arg4[%c1_28, %c0_29, %c0_30] : memref<16x128x128xbf16, #tpu.memory_space<vmem>>, vector<1x128x128xbf16>
    %36 = vector.shape_cast %35 : vector<1x128x128xbf16> to vector<128x128xbf16>
    %cst_31 = arith.constant dense<0.000000e+00> : vector<16x128xf32>
    %37 = tpu.matmul %34, %36, %cst_31 {dimension_numbers = #tpu.dot_dimension_numbers<[1], [0], [0], [1], [0, 0, 1, 1], [], []>} : vector<16x128xbf16>, vector<128x128xbf16>, vector<16x128xf32> -> vector<16x128xf32>
    %c1_32 = arith.constant 1 : index
    %c0_33 = arith.constant 0 : index
    %c0_34 = arith.constant 0 : index
    %38 = vector.load %arg5[%c1_32, %c0_33, %c0_34] : memref<16x1x128xf32, #tpu.memory_space<vmem>>, vector<1x1x128xf32>
    %39 = vector.shape_cast %38 : vector<1x1x128xf32> to vector<1x128xf32>
    %40 = vector.broadcast %39 : vector<1x128xf32> to vector<16x128xf32>
    %41 = arith.addf %37, %40 : vector<16x128xf32>
    %cst_35 = arith.constant 0.000000e+00 : f32
    %42 = vector.broadcast %cst_35 : f32 to vector<16x128xf32>
    %43 = arith.maximumf %41, %42 : vector<16x128xf32>
    %44 = arith.maximumf %22, %43 : vector<16x128xf32>
    %c2 = arith.constant 2 : index
    %c0_36 = arith.constant 0 : index
    %c0_37 = arith.constant 0 : index
    %45 = vector.load %arg1[%c2, %c0_36, %c0_37] : memref<16x16x32xbf16, #tpu.memory_space<vmem>>, vector<1x16x32xbf16>
    %46 = vector.shape_cast %45 : vector<1x16x32xbf16> to vector<16x32xbf16>
    %c2_38 = arith.constant 2 : index
    %c0_39 = arith.constant 0 : index
    %c0_40 = arith.constant 0 : index
    %47 = vector.load %arg2[%c2_38, %c0_39, %c0_40] : memref<16x32x128xbf16, #tpu.memory_space<vmem>>, vector<1x32x128xbf16>
    %48 = vector.shape_cast %47 : vector<1x32x128xbf16> to vector<32x128xbf16>
    %cst_41 = arith.constant dense<0.000000e+00> : vector<16x128xf32>
    %49 = tpu.matmul %46, %48, %cst_41 {dimension_numbers = #tpu.dot_dimension_numbers<[1], [0], [0], [1], [0, 0, 1, 1], [], []>} : vector<16x32xbf16>, vector<32x128xbf16>, vector<16x128xf32> -> vector<16x128xf32>
    %c2_42 = arith.constant 2 : index
    %c0_43 = arith.constant 0 : index
    %c0_44 = arith.constant 0 : index
    %50 = vector.load %arg3[%c2_42, %c0_43, %c0_44] : memref<16x1x128xf32, #tpu.memory_space<vmem>>, vector<1x1x128xf32>
    %51 = vector.shape_cast %50 : vector<1x1x128xf32> to vector<1x128xf32>
    %52 = vector.broadcast %51 : vector<1x128xf32> to vector<16x128xf32>
    %53 = arith.addf %49, %52 : vector<16x128xf32>
    %cst_45 = arith.constant 0.000000e+00 : f32
    %54 = vector.broadcast %cst_45 : f32 to vector<16x128xf32>
    %55 = arith.maximumf %53, %54 : vector<16x128xf32>
    %56 = arith.truncf %55 : vector<16x128xf32> to vector<16x128xbf16>
    %c2_46 = arith.constant 2 : index
    %c0_47 = arith.constant 0 : index
    %c0_48 = arith.constant 0 : index
    %57 = vector.load %arg4[%c2_46, %c0_47, %c0_48] : memref<16x128x128xbf16, #tpu.memory_space<vmem>>, vector<1x128x128xbf16>
    %58 = vector.shape_cast %57 : vector<1x128x128xbf16> to vector<128x128xbf16>
    %cst_49 = arith.constant dense<0.000000e+00> : vector<16x128xf32>
    %59 = tpu.matmul %56, %58, %cst_49 {dimension_numbers = #tpu.dot_dimension_numbers<[1], [0], [0], [1], [0, 0, 1, 1], [], []>} : vector<16x128xbf16>, vector<128x128xbf16>, vector<16x128xf32> -> vector<16x128xf32>
    %c2_50 = arith.constant 2 : index
    %c0_51 = arith.constant 0 : index
    %c0_52 = arith.constant 0 : index
    %60 = vector.load %arg5[%c2_50, %c0_51, %c0_52] : memref<16x1x128xf32, #tpu.memory_space<vmem>>, vector<1x1x128xf32>
    %61 = vector.shape_cast %60 : vector<1x1x128xf32> to vector<1x128xf32>
    %62 = vector.broadcast %61 : vector<1x128xf32> to vector<16x128xf32>
    %63 = arith.addf %59, %62 : vector<16x128xf32>
    %cst_53 = arith.constant 0.000000e+00 : f32
    %64 = vector.broadcast %cst_53 : f32 to vector<16x128xf32>
    %65 = arith.maximumf %63, %64 : vector<16x128xf32>
    %66 = arith.maximumf %44, %65 : vector<16x128xf32>
    %c3 = arith.constant 3 : index
    %c0_54 = arith.constant 0 : index
    %c0_55 = arith.constant 0 : index
    %67 = vector.load %arg1[%c3, %c0_54, %c0_55] : memref<16x16x32xbf16, #tpu.memory_space<vmem>>, vector<1x16x32xbf16>
    %68 = vector.shape_cast %67 : vector<1x16x32xbf16> to vector<16x32xbf16>
    %c3_56 = arith.constant 3 : index
    %c0_57 = arith.constant 0 : index
    %c0_58 = arith.constant 0 : index
    %69 = vector.load %arg2[%c3_56, %c0_57, %c0_58] : memref<16x32x128xbf16, #tpu.memory_space<vmem>>, vector<1x32x128xbf16>
    %70 = vector.shape_cast %69 : vector<1x32x128xbf16> to vector<32x128xbf16>
    %cst_59 = arith.constant dense<0.000000e+00> : vector<16x128xf32>
    %71 = tpu.matmul %68, %70, %cst_59 {dimension_numbers = #tpu.dot_dimension_numbers<[1], [0], [0], [1], [0, 0, 1, 1], [], []>} : vector<16x32xbf16>, vector<32x128xbf16>, vector<16x128xf32> -> vector<16x128xf32>
    %c3_60 = arith.constant 3 : index
    %c0_61 = arith.constant 0 : index
    %c0_62 = arith.constant 0 : index
    %72 = vector.load %arg3[%c3_60, %c0_61, %c0_62] : memref<16x1x128xf32, #tpu.memory_space<vmem>>, vector<1x1x128xf32>
    %73 = vector.shape_cast %72 : vector<1x1x128xf32> to vector<1x128xf32>
    %74 = vector.broadcast %73 : vector<1x128xf32> to vector<16x128xf32>
    %75 = arith.addf %71, %74 : vector<16x128xf32>
    %cst_63 = arith.constant 0.000000e+00 : f32
    %76 = vector.broadcast %cst_63 : f32 to vector<16x128xf32>
    %77 = arith.maximumf %75, %76 : vector<16x128xf32>
    %78 = arith.truncf %77 : vector<16x128xf32> to vector<16x128xbf16>
    %c3_64 = arith.constant 3 : index
    %c0_65 = arith.constant 0 : index
    %c0_66 = arith.constant 0 : index
    %79 = vector.load %arg4[%c3_64, %c0_65, %c0_66] : memref<16x128x128xbf16, #tpu.memory_space<vmem>>, vector<1x128x128xbf16>
    %80 = vector.shape_cast %79 : vector<1x128x128xbf16> to vector<128x128xbf16>
    %cst_67 = arith.constant dense<0.000000e+00> : vector<16x128xf32>
    %81 = tpu.matmul %78, %80, %cst_67 {dimension_numbers = #tpu.dot_dimension_numbers<[1], [0], [0], [1], [0, 0, 1, 1], [], []>} : vector<16x128xbf16>, vector<128x128xbf16>, vector<16x128xf32> -> vector<16x128xf32>
    %c3_68 = arith.constant 3 : index
    %c0_69 = arith.constant 0 : index
    %c0_70 = arith.constant 0 : index
    %82 = vector.load %arg5[%c3_68, %c0_69, %c0_70] : memref<16x1x128xf32, #tpu.memory_space<vmem>>, vector<1x1x128xf32>
    %83 = vector.shape_cast %82 : vector<1x1x128xf32> to vector<1x128xf32>
    %84 = vector.broadcast %83 : vector<1x128xf32> to vector<16x128xf32>
    %85 = arith.addf %81, %84 : vector<16x128xf32>
    %cst_71 = arith.constant 0.000000e+00 : f32
    %86 = vector.broadcast %cst_71 : f32 to vector<16x128xf32>
    %87 = arith.maximumf %85, %86 : vector<16x128xf32>
    %88 = arith.maximumf %66, %87 : vector<16x128xf32>
    %c4 = arith.constant 4 : index
    %c0_72 = arith.constant 0 : index
    %c0_73 = arith.constant 0 : index
    %89 = vector.load %arg1[%c4, %c0_72, %c0_73] : memref<16x16x32xbf16, #tpu.memory_space<vmem>>, vector<1x16x32xbf16>
    %90 = vector.shape_cast %89 : vector<1x16x32xbf16> to vector<16x32xbf16>
    %c4_74 = arith.constant 4 : index
    %c0_75 = arith.constant 0 : index
    %c0_76 = arith.constant 0 : index
    %91 = vector.load %arg2[%c4_74, %c0_75, %c0_76] : memref<16x32x128xbf16, #tpu.memory_space<vmem>>, vector<1x32x128xbf16>
    %92 = vector.shape_cast %91 : vector<1x32x128xbf16> to vector<32x128xbf16>
    %cst_77 = arith.constant dense<0.000000e+00> : vector<16x128xf32>
    %93 = tpu.matmul %90, %92, %cst_77 {dimension_numbers = #tpu.dot_dimension_numbers<[1], [0], [0], [1], [0, 0, 1, 1], [], []>} : vector<16x32xbf16>, vector<32x128xbf16>, vector<16x128xf32> -> vector<16x128xf32>
    %c4_78 = arith.constant 4 : index
    %c0_79 = arith.constant 0 : index
    %c0_80 = arith.constant 0 : index
    %94 = vector.load %arg3[%c4_78, %c0_79, %c0_80] : memref<16x1x128xf32, #tpu.memory_space<vmem>>, vector<1x1x128xf32>
    %95 = vector.shape_cast %94 : vector<1x1x128xf32> to vector<1x128xf32>
    %96 = vector.broadcast %95 : vector<1x128xf32> to vector<16x128xf32>
    %97 = arith.addf %93, %96 : vector<16x128xf32>
    %cst_81 = arith.constant 0.000000e+00 : f32
    %98 = vector.broadcast %cst_81 : f32 to vector<16x128xf32>
    %99 = arith.maximumf %97, %98 : vector<16x128xf32>
    %100 = arith.truncf %99 : vector<16x128xf32> to vector<16x128xbf16>
    %c4_82 = arith.constant 4 : index
    %c0_83 = arith.constant 0 : index
    %c0_84 = arith.constant 0 : index
    %101 = vector.load %arg4[%c4_82, %c0_83, %c0_84] : memref<16x128x128xbf16, #tpu.memory_space<vmem>>, vector<1x128x128xbf16>
    %102 = vector.shape_cast %101 : vector<1x128x128xbf16> to vector<128x128xbf16>
    %cst_85 = arith.constant dense<0.000000e+00> : vector<16x128xf32>
    %103 = tpu.matmul %100, %102, %cst_85 {dimension_numbers = #tpu.dot_dimension_numbers<[1], [0], [0], [1], [0, 0, 1, 1], [], []>} : vector<16x128xbf16>, vector<128x128xbf16>, vector<16x128xf32> -> vector<16x128xf32>
    %c4_86 = arith.constant 4 : index
    %c0_87 = arith.constant 0 : index
    %c0_88 = arith.constant 0 : index
    %104 = vector.load %arg5[%c4_86, %c0_87, %c0_88] : memref<16x1x128xf32, #tpu.memory_space<vmem>>, vector<1x1x128xf32>
    %105 = vector.shape_cast %104 : vector<1x1x128xf32> to vector<1x128xf32>
    %106 = vector.broadcast %105 : vector<1x128xf32> to vector<16x128xf32>
    %107 = arith.addf %103, %106 : vector<16x128xf32>
    %cst_89 = arith.constant 0.000000e+00 : f32
    %108 = vector.broadcast %cst_89 : f32 to vector<16x128xf32>
    %109 = arith.maximumf %107, %108 : vector<16x128xf32>
    %110 = arith.maximumf %88, %109 : vector<16x128xf32>
    %c5 = arith.constant 5 : index
    %c0_90 = arith.constant 0 : index
    %c0_91 = arith.constant 0 : index
    %111 = vector.load %arg1[%c5, %c0_90, %c0_91] : memref<16x16x32xbf16, #tpu.memory_space<vmem>>, vector<1x16x32xbf16>
    %112 = vector.shape_cast %111 : vector<1x16x32xbf16> to vector<16x32xbf16>
    %c5_92 = arith.constant 5 : index
    %c0_93 = arith.constant 0 : index
    %c0_94 = arith.constant 0 : index
    %113 = vector.load %arg2[%c5_92, %c0_93, %c0_94] : memref<16x32x128xbf16, #tpu.memory_space<vmem>>, vector<1x32x128xbf16>
    %114 = vector.shape_cast %113 : vector<1x32x128xbf16> to vector<32x128xbf16>
    %cst_95 = arith.constant dense<0.000000e+00> : vector<16x128xf32>
    %115 = tpu.matmul %112, %114, %cst_95 {dimension_numbers = #tpu.dot_dimension_numbers<[1], [0], [0], [1], [0, 0, 1, 1], [], []>} : vector<16x32xbf16>, vector<32x128xbf16>, vector<16x128xf32> -> vector<16x128xf32>
    %c5_96 = arith.constant 5 : index
    %c0_97 = arith.constant 0 : index
    %c0_98 = arith.constant 0 : index
    %116 = vector.load %arg3[%c5_96, %c0_97, %c0_98] : memref<16x1x128xf32, #tpu.memory_space<vmem>>, vector<1x1x128xf32>
    %117 = vector.shape_cast %116 : vector<1x1x128xf32> to vector<1x128xf32>
    %118 = vector.broadcast %117 : vector<1x128xf32> to vector<16x128xf32>
    %119 = arith.addf %115, %118 : vector<16x128xf32>
    %cst_99 = arith.constant 0.000000e+00 : f32
    %120 = vector.broadcast %cst_99 : f32 to vector<16x128xf32>
    %121 = arith.maximumf %119, %120 : vector<16x128xf32>
    %122 = arith.truncf %121 : vector<16x128xf32> to vector<16x128xbf16>
    %c5_100 = arith.constant 5 : index
    %c0_101 = arith.constant 0 : index
    %c0_102 = arith.constant 0 : index
    %123 = vector.load %arg4[%c5_100, %c0_101, %c0_102] : memref<16x128x128xbf16, #tpu.memory_space<vmem>>, vector<1x128x128xbf16>
    %124 = vector.shape_cast %123 : vector<1x128x128xbf16> to vector<128x128xbf16>
    %cst_103 = arith.constant dense<0.000000e+00> : vector<16x128xf32>
    %125 = tpu.matmul %122, %124, %cst_103 {dimension_numbers = #tpu.dot_dimension_numbers<[1], [0], [0], [1], [0, 0, 1, 1], [], []>} : vector<16x128xbf16>, vector<128x128xbf16>, vector<16x128xf32> -> vector<16x128xf32>
    %c5_104 = arith.constant 5 : index
    %c0_105 = arith.constant 0 : index
    %c0_106 = arith.constant 0 : index
    %126 = vector.load %arg5[%c5_104, %c0_105, %c0_106] : memref<16x1x128xf32, #tpu.memory_space<vmem>>, vector<1x1x128xf32>
    %127 = vector.shape_cast %126 : vector<1x1x128xf32> to vector<1x128xf32>
    %128 = vector.broadcast %127 : vector<1x128xf32> to vector<16x128xf32>
    %129 = arith.addf %125, %128 : vector<16x128xf32>
    %cst_107 = arith.constant 0.000000e+00 : f32
    %130 = vector.broadcast %cst_107 : f32 to vector<16x128xf32>
    %131 = arith.maximumf %129, %130 : vector<16x128xf32>
    %132 = arith.maximumf %110, %131 : vector<16x128xf32>
    %c6 = arith.constant 6 : index
    %c0_108 = arith.constant 0 : index
    %c0_109 = arith.constant 0 : index
    %133 = vector.load %arg1[%c6, %c0_108, %c0_109] : memref<16x16x32xbf16, #tpu.memory_space<vmem>>, vector<1x16x32xbf16>
    %134 = vector.shape_cast %133 : vector<1x16x32xbf16> to vector<16x32xbf16>
    %c6_110 = arith.constant 6 : index
    %c0_111 = arith.constant 0 : index
    %c0_112 = arith.constant 0 : index
    %135 = vector.load %arg2[%c6_110, %c0_111, %c0_112] : memref<16x32x128xbf16, #tpu.memory_space<vmem>>, vector<1x32x128xbf16>
    %136 = vector.shape_cast %135 : vector<1x32x128xbf16> to vector<32x128xbf16>
    %cst_113 = arith.constant dense<0.000000e+00> : vector<16x128xf32>
    %137 = tpu.matmul %134, %136, %cst_113 {dimension_numbers = #tpu.dot_dimension_numbers<[1], [0], [0], [1], [0, 0, 1, 1], [], []>} : vector<16x32xbf16>, vector<32x128xbf16>, vector<16x128xf32> -> vector<16x128xf32>
    %c6_114 = arith.constant 6 : index
    %c0_115 = arith.constant 0 : index
    %c0_116 = arith.constant 0 : index
    %138 = vector.load %arg3[%c6_114, %c0_115, %c0_116] : memref<16x1x128xf32, #tpu.memory_space<vmem>>, vector<1x1x128xf32>
    %139 = vector.shape_cast %138 : vector<1x1x128xf32> to vector<1x128xf32>
    %140 = vector.broadcast %139 : vector<1x128xf32> to vector<16x128xf32>
    %141 = arith.addf %137, %140 : vector<16x128xf32>
    %cst_117 = arith.constant 0.000000e+00 : f32
    %142 = vector.broadcast %cst_117 : f32 to vector<16x128xf32>
    %143 = arith.maximumf %141, %142 : vector<16x128xf32>
    %144 = arith.truncf %143 : vector<16x128xf32> to vector<16x128xbf16>
    %c6_118 = arith.constant 6 : index
    %c0_119 = arith.constant 0 : index
    %c0_120 = arith.constant 0 : index
    %145 = vector.load %arg4[%c6_118, %c0_119, %c0_120] : memref<16x128x128xbf16, #tpu.memory_space<vmem>>, vector<1x128x128xbf16>
    %146 = vector.shape_cast %145 : vector<1x128x128xbf16> to vector<128x128xbf16>
    %cst_121 = arith.constant dense<0.000000e+00> : vector<16x128xf32>
    %147 = tpu.matmul %144, %146, %cst_121 {dimension_numbers = #tpu.dot_dimension_numbers<[1], [0], [0], [1], [0, 0, 1, 1], [], []>} : vector<16x128xbf16>, vector<128x128xbf16>, vector<16x128xf32> -> vector<16x128xf32>
    %c6_122 = arith.constant 6 : index
    %c0_123 = arith.constant 0 : index
    %c0_124 = arith.constant 0 : index
    %148 = vector.load %arg5[%c6_122, %c0_123, %c0_124] : memref<16x1x128xf32, #tpu.memory_space<vmem>>, vector<1x1x128xf32>
    %149 = vector.shape_cast %148 : vector<1x1x128xf32> to vector<1x128xf32>
    %150 = vector.broadcast %149 : vector<1x128xf32> to vector<16x128xf32>
    %151 = arith.addf %147, %150 : vector<16x128xf32>
    %cst_125 = arith.constant 0.000000e+00 : f32
    %152 = vector.broadcast %cst_125 : f32 to vector<16x128xf32>
    %153 = arith.maximumf %151, %152 : vector<16x128xf32>
    %154 = arith.maximumf %132, %153 : vector<16x128xf32>
    %c7 = arith.constant 7 : index
    %c0_126 = arith.constant 0 : index
    %c0_127 = arith.constant 0 : index
    %155 = vector.load %arg1[%c7, %c0_126, %c0_127] : memref<16x16x32xbf16, #tpu.memory_space<vmem>>, vector<1x16x32xbf16>
    %156 = vector.shape_cast %155 : vector<1x16x32xbf16> to vector<16x32xbf16>
    %c7_128 = arith.constant 7 : index
    %c0_129 = arith.constant 0 : index
    %c0_130 = arith.constant 0 : index
    %157 = vector.load %arg2[%c7_128, %c0_129, %c0_130] : memref<16x32x128xbf16, #tpu.memory_space<vmem>>, vector<1x32x128xbf16>
    %158 = vector.shape_cast %157 : vector<1x32x128xbf16> to vector<32x128xbf16>
    %cst_131 = arith.constant dense<0.000000e+00> : vector<16x128xf32>
    %159 = tpu.matmul %156, %158, %cst_131 {dimension_numbers = #tpu.dot_dimension_numbers<[1], [0], [0], [1], [0, 0, 1, 1], [], []>} : vector<16x32xbf16>, vector<32x128xbf16>, vector<16x128xf32> -> vector<16x128xf32>
    %c7_132 = arith.constant 7 : index
    %c0_133 = arith.constant 0 : index
    %c0_134 = arith.constant 0 : index
    %160 = vector.load %arg3[%c7_132, %c0_133, %c0_134] : memref<16x1x128xf32, #tpu.memory_space<vmem>>, vector<1x1x128xf32>
    %161 = vector.shape_cast %160 : vector<1x1x128xf32> to vector<1x128xf32>
    %162 = vector.broadcast %161 : vector<1x128xf32> to vector<16x128xf32>
    %163 = arith.addf %159, %162 : vector<16x128xf32>
    %cst_135 = arith.constant 0.000000e+00 : f32
    %164 = vector.broadcast %cst_135 : f32 to vector<16x128xf32>
    %165 = arith.maximumf %163, %164 : vector<16x128xf32>
    %166 = arith.truncf %165 : vector<16x128xf32> to vector<16x128xbf16>
    %c7_136 = arith.constant 7 : index
    %c0_137 = arith.constant 0 : index
    %c0_138 = arith.constant 0 : index
    %167 = vector.load %arg4[%c7_136, %c0_137, %c0_138] : memref<16x128x128xbf16, #tpu.memory_space<vmem>>, vector<1x128x128xbf16>
    %168 = vector.shape_cast %167 : vector<1x128x128xbf16> to vector<128x128xbf16>
    %cst_139 = arith.constant dense<0.000000e+00> : vector<16x128xf32>
    %169 = tpu.matmul %166, %168, %cst_139 {dimension_numbers = #tpu.dot_dimension_numbers<[1], [0], [0], [1], [0, 0, 1, 1], [], []>} : vector<16x128xbf16>, vector<128x128xbf16>, vector<16x128xf32> -> vector<16x128xf32>
    %c7_140 = arith.constant 7 : index
    %c0_141 = arith.constant 0 : index
    %c0_142 = arith.constant 0 : index
    %170 = vector.load %arg5[%c7_140, %c0_141, %c0_142] : memref<16x1x128xf32, #tpu.memory_space<vmem>>, vector<1x1x128xf32>
    %171 = vector.shape_cast %170 : vector<1x1x128xf32> to vector<1x128xf32>
    %172 = vector.broadcast %171 : vector<1x128xf32> to vector<16x128xf32>
    %173 = arith.addf %169, %172 : vector<16x128xf32>
    %cst_143 = arith.constant 0.000000e+00 : f32
    %174 = vector.broadcast %cst_143 : f32 to vector<16x128xf32>
    %175 = arith.maximumf %173, %174 : vector<16x128xf32>
    %176 = arith.maximumf %154, %175 : vector<16x128xf32>
    %c8 = arith.constant 8 : index
    %c0_144 = arith.constant 0 : index
    %c0_145 = arith.constant 0 : index
    %177 = vector.load %arg1[%c8, %c0_144, %c0_145] : memref<16x16x32xbf16, #tpu.memory_space<vmem>>, vector<1x16x32xbf16>
    %178 = vector.shape_cast %177 : vector<1x16x32xbf16> to vector<16x32xbf16>
    %c8_146 = arith.constant 8 : index
    %c0_147 = arith.constant 0 : index
    %c0_148 = arith.constant 0 : index
    %179 = vector.load %arg2[%c8_146, %c0_147, %c0_148] : memref<16x32x128xbf16, #tpu.memory_space<vmem>>, vector<1x32x128xbf16>
    %180 = vector.shape_cast %179 : vector<1x32x128xbf16> to vector<32x128xbf16>
    %cst_149 = arith.constant dense<0.000000e+00> : vector<16x128xf32>
    %181 = tpu.matmul %178, %180, %cst_149 {dimension_numbers = #tpu.dot_dimension_numbers<[1], [0], [0], [1], [0, 0, 1, 1], [], []>} : vector<16x32xbf16>, vector<32x128xbf16>, vector<16x128xf32> -> vector<16x128xf32>
    %c8_150 = arith.constant 8 : index
    %c0_151 = arith.constant 0 : index
    %c0_152 = arith.constant 0 : index
    %182 = vector.load %arg3[%c8_150, %c0_151, %c0_152] : memref<16x1x128xf32, #tpu.memory_space<vmem>>, vector<1x1x128xf32>
    %183 = vector.shape_cast %182 : vector<1x1x128xf32> to vector<1x128xf32>
    %184 = vector.broadcast %183 : vector<1x128xf32> to vector<16x128xf32>
    %185 = arith.addf %181, %184 : vector<16x128xf32>
    %cst_153 = arith.constant 0.000000e+00 : f32
    %186 = vector.broadcast %cst_153 : f32 to vector<16x128xf32>
    %187 = arith.maximumf %185, %186 : vector<16x128xf32>
    %188 = arith.truncf %187 : vector<16x128xf32> to vector<16x128xbf16>
    %c8_154 = arith.constant 8 : index
    %c0_155 = arith.constant 0 : index
    %c0_156 = arith.constant 0 : index
    %189 = vector.load %arg4[%c8_154, %c0_155, %c0_156] : memref<16x128x128xbf16, #tpu.memory_space<vmem>>, vector<1x128x128xbf16>
    %190 = vector.shape_cast %189 : vector<1x128x128xbf16> to vector<128x128xbf16>
    %cst_157 = arith.constant dense<0.000000e+00> : vector<16x128xf32>
    %191 = tpu.matmul %188, %190, %cst_157 {dimension_numbers = #tpu.dot_dimension_numbers<[1], [0], [0], [1], [0, 0, 1, 1], [], []>} : vector<16x128xbf16>, vector<128x128xbf16>, vector<16x128xf32> -> vector<16x128xf32>
    %c8_158 = arith.constant 8 : index
    %c0_159 = arith.constant 0 : index
    %c0_160 = arith.constant 0 : index
    %192 = vector.load %arg5[%c8_158, %c0_159, %c0_160] : memref<16x1x128xf32, #tpu.memory_space<vmem>>, vector<1x1x128xf32>
    %193 = vector.shape_cast %192 : vector<1x1x128xf32> to vector<1x128xf32>
    %194 = vector.broadcast %193 : vector<1x128xf32> to vector<16x128xf32>
    %195 = arith.addf %191, %194 : vector<16x128xf32>
    %cst_161 = arith.constant 0.000000e+00 : f32
    %196 = vector.broadcast %cst_161 : f32 to vector<16x128xf32>
    %197 = arith.maximumf %195, %196 : vector<16x128xf32>
    %198 = arith.maximumf %176, %197 : vector<16x128xf32>
    %c9 = arith.constant 9 : index
    %c0_162 = arith.constant 0 : index
    %c0_163 = arith.constant 0 : index
    %199 = vector.load %arg1[%c9, %c0_162, %c0_163] : memref<16x16x32xbf16, #tpu.memory_space<vmem>>, vector<1x16x32xbf16>
    %200 = vector.shape_cast %199 : vector<1x16x32xbf16> to vector<16x32xbf16>
    %c9_164 = arith.constant 9 : index
    %c0_165 = arith.constant 0 : index
    %c0_166 = arith.constant 0 : index
    %201 = vector.load %arg2[%c9_164, %c0_165, %c0_166] : memref<16x32x128xbf16, #tpu.memory_space<vmem>>, vector<1x32x128xbf16>
    %202 = vector.shape_cast %201 : vector<1x32x128xbf16> to vector<32x128xbf16>
    %cst_167 = arith.constant dense<0.000000e+00> : vector<16x128xf32>
    %203 = tpu.matmul %200, %202, %cst_167 {dimension_numbers = #tpu.dot_dimension_numbers<[1], [0], [0], [1], [0, 0, 1, 1], [], []>} : vector<16x32xbf16>, vector<32x128xbf16>, vector<16x128xf32> -> vector<16x128xf32>
    %c9_168 = arith.constant 9 : index
    %c0_169 = arith.constant 0 : index
    %c0_170 = arith.constant 0 : index
    %204 = vector.load %arg3[%c9_168, %c0_169, %c0_170] : memref<16x1x128xf32, #tpu.memory_space<vmem>>, vector<1x1x128xf32>
    %205 = vector.shape_cast %204 : vector<1x1x128xf32> to vector<1x128xf32>
    %206 = vector.broadcast %205 : vector<1x128xf32> to vector<16x128xf32>
    %207 = arith.addf %203, %206 : vector<16x128xf32>
    %cst_171 = arith.constant 0.000000e+00 : f32
    %208 = vector.broadcast %cst_171 : f32 to vector<16x128xf32>
    %209 = arith.maximumf %207, %208 : vector<16x128xf32>
    %210 = arith.truncf %209 : vector<16x128xf32> to vector<16x128xbf16>
    %c9_172 = arith.constant 9 : index
    %c0_173 = arith.constant 0 : index
    %c0_174 = arith.constant 0 : index
    %211 = vector.load %arg4[%c9_172, %c0_173, %c0_174] : memref<16x128x128xbf16, #tpu.memory_space<vmem>>, vector<1x128x128xbf16>
    %212 = vector.shape_cast %211 : vector<1x128x128xbf16> to vector<128x128xbf16>
    %cst_175 = arith.constant dense<0.000000e+00> : vector<16x128xf32>
    %213 = tpu.matmul %210, %212, %cst_175 {dimension_numbers = #tpu.dot_dimension_numbers<[1], [0], [0], [1], [0, 0, 1, 1], [], []>} : vector<16x128xbf16>, vector<128x128xbf16>, vector<16x128xf32> -> vector<16x128xf32>
    %c9_176 = arith.constant 9 : index
    %c0_177 = arith.constant 0 : index
    %c0_178 = arith.constant 0 : index
    %214 = vector.load %arg5[%c9_176, %c0_177, %c0_178] : memref<16x1x128xf32, #tpu.memory_space<vmem>>, vector<1x1x128xf32>
    %215 = vector.shape_cast %214 : vector<1x1x128xf32> to vector<1x128xf32>
    %216 = vector.broadcast %215 : vector<1x128xf32> to vector<16x128xf32>
    %217 = arith.addf %213, %216 : vector<16x128xf32>
    %cst_179 = arith.constant 0.000000e+00 : f32
    %218 = vector.broadcast %cst_179 : f32 to vector<16x128xf32>
    %219 = arith.maximumf %217, %218 : vector<16x128xf32>
    %220 = arith.maximumf %198, %219 : vector<16x128xf32>
    %c10 = arith.constant 10 : index
    %c0_180 = arith.constant 0 : index
    %c0_181 = arith.constant 0 : index
    %221 = vector.load %arg1[%c10, %c0_180, %c0_181] : memref<16x16x32xbf16, #tpu.memory_space<vmem>>, vector<1x16x32xbf16>
    %222 = vector.shape_cast %221 : vector<1x16x32xbf16> to vector<16x32xbf16>
    %c10_182 = arith.constant 10 : index
    %c0_183 = arith.constant 0 : index
    %c0_184 = arith.constant 0 : index
    %223 = vector.load %arg2[%c10_182, %c0_183, %c0_184] : memref<16x32x128xbf16, #tpu.memory_space<vmem>>, vector<1x32x128xbf16>
    %224 = vector.shape_cast %223 : vector<1x32x128xbf16> to vector<32x128xbf16>
    %cst_185 = arith.constant dense<0.000000e+00> : vector<16x128xf32>
    %225 = tpu.matmul %222, %224, %cst_185 {dimension_numbers = #tpu.dot_dimension_numbers<[1], [0], [0], [1], [0, 0, 1, 1], [], []>} : vector<16x32xbf16>, vector<32x128xbf16>, vector<16x128xf32> -> vector<16x128xf32>
    %c10_186 = arith.constant 10 : index
    %c0_187 = arith.constant 0 : index
    %c0_188 = arith.constant 0 : index
    %226 = vector.load %arg3[%c10_186, %c0_187, %c0_188] : memref<16x1x128xf32, #tpu.memory_space<vmem>>, vector<1x1x128xf32>
    %227 = vector.shape_cast %226 : vector<1x1x128xf32> to vector<1x128xf32>
    %228 = vector.broadcast %227 : vector<1x128xf32> to vector<16x128xf32>
    %229 = arith.addf %225, %228 : vector<16x128xf32>
    %cst_189 = arith.constant 0.000000e+00 : f32
    %230 = vector.broadcast %cst_189 : f32 to vector<16x128xf32>
    %231 = arith.maximumf %229, %230 : vector<16x128xf32>
    %232 = arith.truncf %231 : vector<16x128xf32> to vector<16x128xbf16>
    %c10_190 = arith.constant 10 : index
    %c0_191 = arith.constant 0 : index
    %c0_192 = arith.constant 0 : index
    %233 = vector.load %arg4[%c10_190, %c0_191, %c0_192] : memref<16x128x128xbf16, #tpu.memory_space<vmem>>, vector<1x128x128xbf16>
    %234 = vector.shape_cast %233 : vector<1x128x128xbf16> to vector<128x128xbf16>
    %cst_193 = arith.constant dense<0.000000e+00> : vector<16x128xf32>
    %235 = tpu.matmul %232, %234, %cst_193 {dimension_numbers = #tpu.dot_dimension_numbers<[1], [0], [0], [1], [0, 0, 1, 1], [], []>} : vector<16x128xbf16>, vector<128x128xbf16>, vector<16x128xf32> -> vector<16x128xf32>
    %c10_194 = arith.constant 10 : index
    %c0_195 = arith.constant 0 : index
    %c0_196 = arith.constant 0 : index
    %236 = vector.load %arg5[%c10_194, %c0_195, %c0_196] : memref<16x1x128xf32, #tpu.memory_space<vmem>>, vector<1x1x128xf32>
    %237 = vector.shape_cast %236 : vector<1x1x128xf32> to vector<1x128xf32>
    %238 = vector.broadcast %237 : vector<1x128xf32> to vector<16x128xf32>
    %239 = arith.addf %235, %238 : vector<16x128xf32>
    %cst_197 = arith.constant 0.000000e+00 : f32
    %240 = vector.broadcast %cst_197 : f32 to vector<16x128xf32>
    %241 = arith.maximumf %239, %240 : vector<16x128xf32>
    %242 = arith.maximumf %220, %241 : vector<16x128xf32>
    %c11 = arith.constant 11 : index
    %c0_198 = arith.constant 0 : index
    %c0_199 = arith.constant 0 : index
    %243 = vector.load %arg1[%c11, %c0_198, %c0_199] : memref<16x16x32xbf16, #tpu.memory_space<vmem>>, vector<1x16x32xbf16>
    %244 = vector.shape_cast %243 : vector<1x16x32xbf16> to vector<16x32xbf16>
    %c11_200 = arith.constant 11 : index
    %c0_201 = arith.constant 0 : index
    %c0_202 = arith.constant 0 : index
    %245 = vector.load %arg2[%c11_200, %c0_201, %c0_202] : memref<16x32x128xbf16, #tpu.memory_space<vmem>>, vector<1x32x128xbf16>
    %246 = vector.shape_cast %245 : vector<1x32x128xbf16> to vector<32x128xbf16>
    %cst_203 = arith.constant dense<0.000000e+00> : vector<16x128xf32>
    %247 = tpu.matmul %244, %246, %cst_203 {dimension_numbers = #tpu.dot_dimension_numbers<[1], [0], [0], [1], [0, 0, 1, 1], [], []>} : vector<16x32xbf16>, vector<32x128xbf16>, vector<16x128xf32> -> vector<16x128xf32>
    %c11_204 = arith.constant 11 : index
    %c0_205 = arith.constant 0 : index
    %c0_206 = arith.constant 0 : index
    %248 = vector.load %arg3[%c11_204, %c0_205, %c0_206] : memref<16x1x128xf32, #tpu.memory_space<vmem>>, vector<1x1x128xf32>
    %249 = vector.shape_cast %248 : vector<1x1x128xf32> to vector<1x128xf32>
    %250 = vector.broadcast %249 : vector<1x128xf32> to vector<16x128xf32>
    %251 = arith.addf %247, %250 : vector<16x128xf32>
    %cst_207 = arith.constant 0.000000e+00 : f32
    %252 = vector.broadcast %cst_207 : f32 to vector<16x128xf32>
    %253 = arith.maximumf %251, %252 : vector<16x128xf32>
    %254 = arith.truncf %253 : vector<16x128xf32> to vector<16x128xbf16>
    %c11_208 = arith.constant 11 : index
    %c0_209 = arith.constant 0 : index
    %c0_210 = arith.constant 0 : index
    %255 = vector.load %arg4[%c11_208, %c0_209, %c0_210] : memref<16x128x128xbf16, #tpu.memory_space<vmem>>, vector<1x128x128xbf16>
    %256 = vector.shape_cast %255 : vector<1x128x128xbf16> to vector<128x128xbf16>
    %cst_211 = arith.constant dense<0.000000e+00> : vector<16x128xf32>
    %257 = tpu.matmul %254, %256, %cst_211 {dimension_numbers = #tpu.dot_dimension_numbers<[1], [0], [0], [1], [0, 0, 1, 1], [], []>} : vector<16x128xbf16>, vector<128x128xbf16>, vector<16x128xf32> -> vector<16x128xf32>
    %c11_212 = arith.constant 11 : index
    %c0_213 = arith.constant 0 : index
    %c0_214 = arith.constant 0 : index
    %258 = vector.load %arg5[%c11_212, %c0_213, %c0_214] : memref<16x1x128xf32, #tpu.memory_space<vmem>>, vector<1x1x128xf32>
    %259 = vector.shape_cast %258 : vector<1x1x128xf32> to vector<1x128xf32>
    %260 = vector.broadcast %259 : vector<1x128xf32> to vector<16x128xf32>
    %261 = arith.addf %257, %260 : vector<16x128xf32>
    %cst_215 = arith.constant 0.000000e+00 : f32
    %262 = vector.broadcast %cst_215 : f32 to vector<16x128xf32>
    %263 = arith.maximumf %261, %262 : vector<16x128xf32>
    %264 = arith.maximumf %242, %263 : vector<16x128xf32>
    %c12 = arith.constant 12 : index
    %c0_216 = arith.constant 0 : index
    %c0_217 = arith.constant 0 : index
    %265 = vector.load %arg1[%c12, %c0_216, %c0_217] : memref<16x16x32xbf16, #tpu.memory_space<vmem>>, vector<1x16x32xbf16>
    %266 = vector.shape_cast %265 : vector<1x16x32xbf16> to vector<16x32xbf16>
    %c12_218 = arith.constant 12 : index
    %c0_219 = arith.constant 0 : index
    %c0_220 = arith.constant 0 : index
    %267 = vector.load %arg2[%c12_218, %c0_219, %c0_220] : memref<16x32x128xbf16, #tpu.memory_space<vmem>>, vector<1x32x128xbf16>
    %268 = vector.shape_cast %267 : vector<1x32x128xbf16> to vector<32x128xbf16>
    %cst_221 = arith.constant dense<0.000000e+00> : vector<16x128xf32>
    %269 = tpu.matmul %266, %268, %cst_221 {dimension_numbers = #tpu.dot_dimension_numbers<[1], [0], [0], [1], [0, 0, 1, 1], [], []>} : vector<16x32xbf16>, vector<32x128xbf16>, vector<16x128xf32> -> vector<16x128xf32>
    %c12_222 = arith.constant 12 : index
    %c0_223 = arith.constant 0 : index
    %c0_224 = arith.constant 0 : index
    %270 = vector.load %arg3[%c12_222, %c0_223, %c0_224] : memref<16x1x128xf32, #tpu.memory_space<vmem>>, vector<1x1x128xf32>
    %271 = vector.shape_cast %270 : vector<1x1x128xf32> to vector<1x128xf32>
    %272 = vector.broadcast %271 : vector<1x128xf32> to vector<16x128xf32>
    %273 = arith.addf %269, %272 : vector<16x128xf32>
    %cst_225 = arith.constant 0.000000e+00 : f32
    %274 = vector.broadcast %cst_225 : f32 to vector<16x128xf32>
    %275 = arith.maximumf %273, %274 : vector<16x128xf32>
    %276 = arith.truncf %275 : vector<16x128xf32> to vector<16x128xbf16>
    %c12_226 = arith.constant 12 : index
    %c0_227 = arith.constant 0 : index
    %c0_228 = arith.constant 0 : index
    %277 = vector.load %arg4[%c12_226, %c0_227, %c0_228] : memref<16x128x128xbf16, #tpu.memory_space<vmem>>, vector<1x128x128xbf16>
    %278 = vector.shape_cast %277 : vector<1x128x128xbf16> to vector<128x128xbf16>
    %cst_229 = arith.constant dense<0.000000e+00> : vector<16x128xf32>
    %279 = tpu.matmul %276, %278, %cst_229 {dimension_numbers = #tpu.dot_dimension_numbers<[1], [0], [0], [1], [0, 0, 1, 1], [], []>} : vector<16x128xbf16>, vector<128x128xbf16>, vector<16x128xf32> -> vector<16x128xf32>
    %c12_230 = arith.constant 12 : index
    %c0_231 = arith.constant 0 : index
    %c0_232 = arith.constant 0 : index
    %280 = vector.load %arg5[%c12_230, %c0_231, %c0_232] : memref<16x1x128xf32, #tpu.memory_space<vmem>>, vector<1x1x128xf32>
    %281 = vector.shape_cast %280 : vector<1x1x128xf32> to vector<1x128xf32>
    %282 = vector.broadcast %281 : vector<1x128xf32> to vector<16x128xf32>
    %283 = arith.addf %279, %282 : vector<16x128xf32>
    %cst_233 = arith.constant 0.000000e+00 : f32
    %284 = vector.broadcast %cst_233 : f32 to vector<16x128xf32>
    %285 = arith.maximumf %283, %284 : vector<16x128xf32>
    %286 = arith.maximumf %264, %285 : vector<16x128xf32>
    %c13 = arith.constant 13 : index
    %c0_234 = arith.constant 0 : index
    %c0_235 = arith.constant 0 : index
    %287 = vector.load %arg1[%c13, %c0_234, %c0_235] : memref<16x16x32xbf16, #tpu.memory_space<vmem>>, vector<1x16x32xbf16>
    %288 = vector.shape_cast %287 : vector<1x16x32xbf16> to vector<16x32xbf16>
    %c13_236 = arith.constant 13 : index
    %c0_237 = arith.constant 0 : index
    %c0_238 = arith.constant 0 : index
    %289 = vector.load %arg2[%c13_236, %c0_237, %c0_238] : memref<16x32x128xbf16, #tpu.memory_space<vmem>>, vector<1x32x128xbf16>
    %290 = vector.shape_cast %289 : vector<1x32x128xbf16> to vector<32x128xbf16>
    %cst_239 = arith.constant dense<0.000000e+00> : vector<16x128xf32>
    %291 = tpu.matmul %288, %290, %cst_239 {dimension_numbers = #tpu.dot_dimension_numbers<[1], [0], [0], [1], [0, 0, 1, 1], [], []>} : vector<16x32xbf16>, vector<32x128xbf16>, vector<16x128xf32> -> vector<16x128xf32>
    %c13_240 = arith.constant 13 : index
    %c0_241 = arith.constant 0 : index
    %c0_242 = arith.constant 0 : index
    %292 = vector.load %arg3[%c13_240, %c0_241, %c0_242] : memref<16x1x128xf32, #tpu.memory_space<vmem>>, vector<1x1x128xf32>
    %293 = vector.shape_cast %292 : vector<1x1x128xf32> to vector<1x128xf32>
    %294 = vector.broadcast %293 : vector<1x128xf32> to vector<16x128xf32>
    %295 = arith.addf %291, %294 : vector<16x128xf32>
    %cst_243 = arith.constant 0.000000e+00 : f32
    %296 = vector.broadcast %cst_243 : f32 to vector<16x128xf32>
    %297 = arith.maximumf %295, %296 : vector<16x128xf32>
    %298 = arith.truncf %297 : vector<16x128xf32> to vector<16x128xbf16>
    %c13_244 = arith.constant 13 : index
    %c0_245 = arith.constant 0 : index
    %c0_246 = arith.constant 0 : index
    %299 = vector.load %arg4[%c13_244, %c0_245, %c0_246] : memref<16x128x128xbf16, #tpu.memory_space<vmem>>, vector<1x128x128xbf16>
    %300 = vector.shape_cast %299 : vector<1x128x128xbf16> to vector<128x128xbf16>
    %cst_247 = arith.constant dense<0.000000e+00> : vector<16x128xf32>
    %301 = tpu.matmul %298, %300, %cst_247 {dimension_numbers = #tpu.dot_dimension_numbers<[1], [0], [0], [1], [0, 0, 1, 1], [], []>} : vector<16x128xbf16>, vector<128x128xbf16>, vector<16x128xf32> -> vector<16x128xf32>
    %c13_248 = arith.constant 13 : index
    %c0_249 = arith.constant 0 : index
    %c0_250 = arith.constant 0 : index
    %302 = vector.load %arg5[%c13_248, %c0_249, %c0_250] : memref<16x1x128xf32, #tpu.memory_space<vmem>>, vector<1x1x128xf32>
    %303 = vector.shape_cast %302 : vector<1x1x128xf32> to vector<1x128xf32>
    %304 = vector.broadcast %303 : vector<1x128xf32> to vector<16x128xf32>
    %305 = arith.addf %301, %304 : vector<16x128xf32>
    %cst_251 = arith.constant 0.000000e+00 : f32
    %306 = vector.broadcast %cst_251 : f32 to vector<16x128xf32>
    %307 = arith.maximumf %305, %306 : vector<16x128xf32>
    %308 = arith.maximumf %286, %307 : vector<16x128xf32>
    %c14 = arith.constant 14 : index
    %c0_252 = arith.constant 0 : index
    %c0_253 = arith.constant 0 : index
    %309 = vector.load %arg1[%c14, %c0_252, %c0_253] : memref<16x16x32xbf16, #tpu.memory_space<vmem>>, vector<1x16x32xbf16>
    %310 = vector.shape_cast %309 : vector<1x16x32xbf16> to vector<16x32xbf16>
    %c14_254 = arith.constant 14 : index
    %c0_255 = arith.constant 0 : index
    %c0_256 = arith.constant 0 : index
    %311 = vector.load %arg2[%c14_254, %c0_255, %c0_256] : memref<16x32x128xbf16, #tpu.memory_space<vmem>>, vector<1x32x128xbf16>
    %312 = vector.shape_cast %311 : vector<1x32x128xbf16> to vector<32x128xbf16>
    %cst_257 = arith.constant dense<0.000000e+00> : vector<16x128xf32>
    %313 = tpu.matmul %310, %312, %cst_257 {dimension_numbers = #tpu.dot_dimension_numbers<[1], [0], [0], [1], [0, 0, 1, 1], [], []>} : vector<16x32xbf16>, vector<32x128xbf16>, vector<16x128xf32> -> vector<16x128xf32>
    %c14_258 = arith.constant 14 : index
    %c0_259 = arith.constant 0 : index
    %c0_260 = arith.constant 0 : index
    %314 = vector.load %arg3[%c14_258, %c0_259, %c0_260] : memref<16x1x128xf32, #tpu.memory_space<vmem>>, vector<1x1x128xf32>
    %315 = vector.shape_cast %314 : vector<1x1x128xf32> to vector<1x128xf32>
    %316 = vector.broadcast %315 : vector<1x128xf32> to vector<16x128xf32>
    %317 = arith.addf %313, %316 : vector<16x128xf32>
    %cst_261 = arith.constant 0.000000e+00 : f32
    %318 = vector.broadcast %cst_261 : f32 to vector<16x128xf32>
    %319 = arith.maximumf %317, %318 : vector<16x128xf32>
    %320 = arith.truncf %319 : vector<16x128xf32> to vector<16x128xbf16>
    %c14_262 = arith.constant 14 : index
    %c0_263 = arith.constant 0 : index
    %c0_264 = arith.constant 0 : index
    %321 = vector.load %arg4[%c14_262, %c0_263, %c0_264] : memref<16x128x128xbf16, #tpu.memory_space<vmem>>, vector<1x128x128xbf16>
    %322 = vector.shape_cast %321 : vector<1x128x128xbf16> to vector<128x128xbf16>
    %cst_265 = arith.constant dense<0.000000e+00> : vector<16x128xf32>
    %323 = tpu.matmul %320, %322, %cst_265 {dimension_numbers = #tpu.dot_dimension_numbers<[1], [0], [0], [1], [0, 0, 1, 1], [], []>} : vector<16x128xbf16>, vector<128x128xbf16>, vector<16x128xf32> -> vector<16x128xf32>
    %c14_266 = arith.constant 14 : index
    %c0_267 = arith.constant 0 : index
    %c0_268 = arith.constant 0 : index
    %324 = vector.load %arg5[%c14_266, %c0_267, %c0_268] : memref<16x1x128xf32, #tpu.memory_space<vmem>>, vector<1x1x128xf32>
    %325 = vector.shape_cast %324 : vector<1x1x128xf32> to vector<1x128xf32>
    %326 = vector.broadcast %325 : vector<1x128xf32> to vector<16x128xf32>
    %327 = arith.addf %323, %326 : vector<16x128xf32>
    %cst_269 = arith.constant 0.000000e+00 : f32
    %328 = vector.broadcast %cst_269 : f32 to vector<16x128xf32>
    %329 = arith.maximumf %327, %328 : vector<16x128xf32>
    %330 = arith.maximumf %308, %329 : vector<16x128xf32>
    %c15 = arith.constant 15 : index
    %c0_270 = arith.constant 0 : index
    %c0_271 = arith.constant 0 : index
    %331 = vector.load %arg1[%c15, %c0_270, %c0_271] : memref<16x16x32xbf16, #tpu.memory_space<vmem>>, vector<1x16x32xbf16>
    %332 = vector.shape_cast %331 : vector<1x16x32xbf16> to vector<16x32xbf16>
    %c15_272 = arith.constant 15 : index
    %c0_273 = arith.constant 0 : index
    %c0_274 = arith.constant 0 : index
    %333 = vector.load %arg2[%c15_272, %c0_273, %c0_274] : memref<16x32x128xbf16, #tpu.memory_space<vmem>>, vector<1x32x128xbf16>
    %334 = vector.shape_cast %333 : vector<1x32x128xbf16> to vector<32x128xbf16>
    %cst_275 = arith.constant dense<0.000000e+00> : vector<16x128xf32>
    %335 = tpu.matmul %332, %334, %cst_275 {dimension_numbers = #tpu.dot_dimension_numbers<[1], [0], [0], [1], [0, 0, 1, 1], [], []>} : vector<16x32xbf16>, vector<32x128xbf16>, vector<16x128xf32> -> vector<16x128xf32>
    %c15_276 = arith.constant 15 : index
    %c0_277 = arith.constant 0 : index
    %c0_278 = arith.constant 0 : index
    %336 = vector.load %arg3[%c15_276, %c0_277, %c0_278] : memref<16x1x128xf32, #tpu.memory_space<vmem>>, vector<1x1x128xf32>
    %337 = vector.shape_cast %336 : vector<1x1x128xf32> to vector<1x128xf32>
    %338 = vector.broadcast %337 : vector<1x128xf32> to vector<16x128xf32>
    %339 = arith.addf %335, %338 : vector<16x128xf32>
    %cst_279 = arith.constant 0.000000e+00 : f32
    %340 = vector.broadcast %cst_279 : f32 to vector<16x128xf32>
    %341 = arith.maximumf %339, %340 : vector<16x128xf32>
    %342 = arith.truncf %341 : vector<16x128xf32> to vector<16x128xbf16>
    %c15_280 = arith.constant 15 : index
    %c0_281 = arith.constant 0 : index
    %c0_282 = arith.constant 0 : index
    %343 = vector.load %arg4[%c15_280, %c0_281, %c0_282] : memref<16x128x128xbf16, #tpu.memory_space<vmem>>, vector<1x128x128xbf16>
    %344 = vector.shape_cast %343 : vector<1x128x128xbf16> to vector<128x128xbf16>
    %cst_283 = arith.constant dense<0.000000e+00> : vector<16x128xf32>
    %345 = tpu.matmul %342, %344, %cst_283 {dimension_numbers = #tpu.dot_dimension_numbers<[1], [0], [0], [1], [0, 0, 1, 1], [], []>} : vector<16x128xbf16>, vector<128x128xbf16>, vector<16x128xf32> -> vector<16x128xf32>
    %c15_284 = arith.constant 15 : index
    %c0_285 = arith.constant 0 : index
    %c0_286 = arith.constant 0 : index
    %346 = vector.load %arg5[%c15_284, %c0_285, %c0_286] : memref<16x1x128xf32, #tpu.memory_space<vmem>>, vector<1x1x128xf32>
    %347 = vector.shape_cast %346 : vector<1x1x128xf32> to vector<1x128xf32>
    %348 = vector.broadcast %347 : vector<1x128xf32> to vector<16x128xf32>
    %349 = arith.addf %345, %348 : vector<16x128xf32>
    %cst_287 = arith.constant 0.000000e+00 : f32
    %350 = vector.broadcast %cst_287 : f32 to vector<16x128xf32>
    %351 = arith.maximumf %349, %350 : vector<16x128xf32>
    %352 = arith.maximumf %330, %351 : vector<16x128xf32>
    %353 = arith.truncf %352 : vector<16x128xf32> to vector<16x128xbf16>
    %c0_288 = arith.constant 0 : index
    %c0_289 = arith.constant 0 : index
    %354 = vector.load %arg6[%c0_288, %c0_289] : memref<128x256xbf16, #tpu.memory_space<vmem>>, vector<128x256xbf16>
    %cst_290 = arith.constant dense<0.000000e+00> : vector<16x256xf32>
    %355 = tpu.matmul %353, %354, %cst_290 {dimension_numbers = #tpu.dot_dimension_numbers<[1], [0], [0], [1], [0, 0, 1, 1], [], []>} : vector<16x128xbf16>, vector<128x256xbf16>, vector<16x256xf32> -> vector<16x256xf32>
    %c0_291 = arith.constant 0 : index
    %c0_292 = arith.constant 0 : index
    %356 = vector.load %arg7[%c0_291, %c0_292] : memref<1x256xf32, #tpu.memory_space<vmem>>, vector<1x256xf32>
    %357 = vector.broadcast %356 : vector<1x256xf32> to vector<16x256xf32>
    %358 = arith.addf %355, %357 : vector<16x256xf32>
    %cst_293 = arith.constant 0.000000e+00 : f32
    %359 = vector.broadcast %cst_293 : f32 to vector<16x256xf32>
    %360 = arith.maximumf %358, %359 : vector<16x256xf32>
    %361 = arith.truncf %360 : vector<16x256xf32> to vector<16x256xbf16>
    %c0_294 = arith.constant 0 : index
    %c0_295 = arith.constant 0 : index
    %362 = vector.load %arg8[%c0_294, %c0_295] : memref<256x128xbf16, #tpu.memory_space<vmem>>, vector<256x128xbf16>
    %cst_296 = arith.constant dense<0.000000e+00> : vector<16x128xf32>
    %363 = tpu.matmul %361, %362, %cst_296 {dimension_numbers = #tpu.dot_dimension_numbers<[1], [0], [0], [1], [0, 0, 1, 1], [], []>} : vector<16x256xbf16>, vector<256x128xbf16>, vector<16x128xf32> -> vector<16x128xf32>
    %c0_297 = arith.constant 0 : index
    %c0_298 = arith.constant 0 : index
    %364 = vector.load %arg9[%c0_297, %c0_298] : memref<1x128xf32, #tpu.memory_space<vmem>>, vector<1x128xf32>
    %365 = vector.broadcast %364 : vector<1x128xf32> to vector<16x128xf32>
    %366 = arith.addf %363, %365 : vector<16x128xf32>
    %c0_299 = arith.constant 0 : index
    %c0_300 = arith.constant 0 : index
    %367 = vector.load %arg10[%c0_299, %c0_300] : memref<16x128xf32, #tpu.memory_space<vmem>>, vector<16x128xf32>
    tpu.vector_store %arg10[%c0_299, %c0_300], %366 {strides = array<i32>} : memref<16x128xf32, #tpu.memory_space<vmem>>, vector<16x128xf32>,
    return
  }
  func.func @transform_0(%arg0: i32) -> (i32, i32, i32) {
    %c0_i32 = arith.constant 0 : i32
    %c0_i32_0 = arith.constant 0 : i32
    %c0_i32_1 = arith.constant 0 : i32
    return %c0_i32, %arg0, %c0_i32_0 : i32, i32, i32
  }
  func.func @transform_1(%arg0: i32) -> (i32, i32, i32) {
    %c0_i32 = arith.constant 0 : i32
    %c0_i32_0 = arith.constant 0 : i32
    %c0_i32_1 = arith.constant 0 : i32
    %c0_i32_2 = arith.constant 0 : i32
    return %c0_i32, %c0_i32_0, %c0_i32_1 : i32, i32, i32
  }
  func.func @transform_2(%arg0: i32) -> (i32, i32, i32) {
    %c0_i32 = arith.constant 0 : i32
    %c0_i32_0 = arith.constant 0 : i32
    %c0_i32_1 = arith.constant 0 : i32
    %c0_i32_2 = arith.constant 0 : i32
    return %c0_i32, %c0_i32_0, %c0_i32_1 : i32, i32, i32
  }
  func.func @transform_3(%arg0: i32) -> (i32, i32, i32) {
    %c0_i32 = arith.constant 0 : i32
    %c0_i32_0 = arith.constant 0 : i32
    %c0_i32_1 = arith.constant 0 : i32
    %c0_i32_2 = arith.constant 0 : i32
    return %c0_i32, %c0_i32_0, %c0_i32_1 : i32, i32, i32
  }
  func.func @transform_4(%arg0: i32) -> (i32, i32, i32) {
    %c0_i32 = arith.constant 0 : i32
    %c0_i32_0 = arith.constant 0 : i32
    %c0_i32_1 = arith.constant 0 : i32
    %c0_i32_2 = arith.constant 0 : i32
    return %c0_i32, %c0_i32_0, %c0_i32_1 : i32, i32, i32
  }
  func.func @transform_5(%arg0: i32) -> (i32, i32) {
    %c0_i32 = arith.constant 0 : i32
    %c0_i32_0 = arith.constant 0 : i32
    %c0_i32_1 = arith.constant 0 : i32
    return %c0_i32, %c0_i32_0 : i32, i32
  }
  func.func @transform_6(%arg0: i32) -> (i32, i32) {
    %c0_i32 = arith.constant 0 : i32
    %c0_i32_0 = arith.constant 0 : i32
    %c0_i32_1 = arith.constant 0 : i32
    return %c0_i32, %c0_i32_0 : i32, i32
  }
  func.func @transform_7(%arg0: i32) -> (i32, i32) {
    %c0_i32 = arith.constant 0 : i32
    %c0_i32_0 = arith.constant 0 : i32
    %c0_i32_1 = arith.constant 0 : i32
    return %c0_i32, %c0_i32_0 : i32, i32
  }
  func.func @transform_8(%arg0: i32) -> (i32, i32) {
    %c0_i32 = arith.constant 0 : i32
    %c0_i32_0 = arith.constant 0 : i32
    %c0_i32_1 = arith.constant 0 : i32
    return %c0_i32, %c0_i32_0 : i32, i32
  }
  func.func @transform_9(%arg0: i32) -> (i32, i32) {
    %c0_i32 = arith.constant 0 : i32
    %c0_i32_0 = arith.constant 0 : i32
    return %arg0, %c0_i32 : i32, i32
  }
}

</mosaic_0001>

<bundles_post_ra>
// kernel: local_cnn_small_q_v2_forward.1
= control target key start
LH: loop header
LB: loop body
LE: loop exit
PB: predicated region body
PF: predicated region fallthrough
CT: control target
= control target key end

     0   :  { %v5035_v0 = vmov 0.0   ;;  %vm5036_vm0 = vmmov 0   ;;  %vm63_vm1 = vcmask 261120   ;;  %s6102_s1 = inlined_call_operand.vmem [shape: bf16[16,32,128], index: 1, kind: input, shape index: {}]   ;;  %s6103_s0 = inlined_call_operand.vmem [shape: bf16[16,16,32], index: 0, kind: input, shape index: {}]   ;;  %s6104_s3 = inlined_call_operand.vmem [shape: bf16[16,128,128], index: 3, kind: input, shape index: {}]   ;;  %s6105_s2 = inlined_call_operand.vmem [shape: f32[16,1,128], index: 2, kind: input, shape index: {}]   ;;  %s6106_s4 = inlined_call_operand.vmem [shape: f32[16,1,128], index: 4, kind: input, shape index: {}]   ;;  %s6107_s5 = inlined_call_operand.vmem [shape: bf16[128,256], index: 5, kind: input, shape index: {}]   ;;  %s6108_s7 = inlined_call_operand.vmem [shape: bf16[256,128], index: 7, kind: input, shape index: {}]   ;;  %s6109_s6 = inlined_call_operand.vmem [shape: f32[1,256], index: 6, kind: input, shape index: {}]   ;;  %s6110_s8 = inlined_call_operand.vmem [shape: f32[1,128], index: 8, kind: input, shape index: {}]   ;;  %s6111_s9 = inlined_call_operand.vmem [shape: f32[16,128], index: 9, kind: output, shape index: {}]  }
   0x1   :  { %4368 = vmatprep.subr.bf16.mxu1 %v5035_v0  ;;  %4396 = vmatprep.subr.bf16.mxu0 %v5035_v0  ;;  %v4819_v1 = vld [vmem:[%s6102_s1] sm:$0xff]   ;;  %v4820_v2 = vld [vmem:[%s6102_s1 + $0x10] sm:$0xff]   ;;  %v4821_v3 = vld [vmem:[%s6102_s1 + $0x8] sm:$0xff]  }
   0x2   :  { %4372 = vmatprep.mubr.msk.bf16.mxu1 %vm5036_vm0, %v5035_v0  ;;  %4400 = vmatprep.mubr.msk.bf16.mxu0 %vm5036_vm0, %v5035_v0  ;;  %v4822_v4 = vld [vmem:[%s6102_s1 + $0x18] sm:$0xff]   ;;  %v4823_v5 = vld [vmem:[%s6103_s0] sm:$0xff]   ;;  %v4824_v6 = vld [vmem:[%s6103_s0 + $0x8] sm:$0xff]  }
   0x3   :  { %4369 = vmatpush3.bf16.msra.mxu1 %v4819_v1  ;;  %4397 = vmatpush3.bf16.msra.mxu0 %v4820_v2  ;;  %v4825_v7 = vld [vmem:[%s6104_s3] sm:$0xff]   ;;  %v4827_v9 = vld [vmem:[%s6104_s3 + $0x8] sm:$0xff]   ;;  %v4829_v11 = vld [vmem:[%s6104_s3 + $0x10] sm:$0xff]  }
   0x4   :  { %4370 = vmatprep.subr.bf16.mxu1 %v5035_v0  ;;  %4398 = vmatprep.subr.bf16.mxu0 %v5035_v0  ;;  %v4826_v8 = vld [vmem:[%s6104_s3 + $0x40] sm:$0xff]   ;;  %v4828_v10 = vld [vmem:[%s6104_s3 + $0x48] sm:$0xff]   ;;  %v4830_v12 = vld [vmem:[%s6104_s3 + $0x50] sm:$0xff]  }
   0x5   :  { %v4831_v13 = vld [vmem:[%s6104_s3 + $0x18] sm:$0xff]   ;;  %v4833_v15 = vld [vmem:[%s6104_s3 + $0x20] sm:$0xff]   ;;  %v4835_v17 = vld [vmem:[%s6104_s3 + $0x28] sm:$0xff]  }
   0x6   :  { %v4832_v14 = vld [vmem:[%s6104_s3 + $0x58] sm:$0xff]   ;;  %v4834_v16 = vld [vmem:[%s6104_s3 + $0x60] sm:$0xff]   ;;  %v4836_v18 = vld [vmem:[%s6104_s3 + $0x68] sm:$0xff]  }
   0x7   :  { %4371 = vmatpush3.bf16.msra.mxu1 %v4821_v3  ;;  %4399 = vmatpush3.bf16.msra.mxu0 %v4822_v4  ;;  %v4837_v19 = vld [vmem:[%s6104_s3 + $0x30] sm:$0xff]   ;;  %v4839_v21 = vld [vmem:[%s6104_s3 + $0x38] sm:$0xff]   ;;  %v3537_v23 = vld [vmem:[%s6105_s2] ss:$0 sm:$0xff] }
   0x8   :  { %4376 = vmatprep.subr.bf16.mxu1 %v5035_v0  ;;  %4404 = vmatprep.subr.bf16.mxu0 %v5035_v0  ;;  %v4838_v20 = vld [vmem:[%s6104_s3 + $0x70] sm:$0xff]   ;;  %v4840_v22 = vld [vmem:[%s6104_s3 + $0x78] sm:$0xff]   ;;  %v3558_v24 = vld [vmem:[%s6105_s2 + $0x1] ss:$0 sm:$0xff] }
   0x9   :  { %v4841_v41 = vld [vmem:[%s6102_s1 + $0x20] sm:$0xff]   ;;  %v4842_v43 = vld [vmem:[%s6102_s1 + $0x30] sm:$0xff]   ;;  %v4843_v45 = vld [vmem:[%s6102_s1 + $0x28] sm:$0xff]  }
   0xa   :  { %4373 = vmatmul.mubr.msk.bf16.vlgmr.msra.gmra.mrb[0].mxu1 %vm63_vm1, %v4823_v5  ;;  %4401 = vmatmul.mubr.msk.bf16.vlgmr.msra.gmra.mrb[0].mxu0 %vm63_vm1, %v4824_v6  ;;  %v4844_v46 = vld [vmem:[%s6102_s1 + $0x38] sm:$0xff]   ;;  %v4845_v47 = vld [vmem:[%s6103_s0 + $0x10] sm:$0xff]   ;;  %v4847_v49 = vld [vmem:[%s6104_s3 + $0x80] sm:$0xff]  }
   0xb   :  { %4377 = vmatpush3.bf16.msra.mxu1 %v4825_v7  ;;  %4405 = vmatpush3.bf16.msra.mxu0 %v4826_v8  ;;  %v4846_v48 = vld [vmem:[%s6103_s0 + $0x18] sm:$0xff]   ;;  %v4848_v50 = vld [vmem:[%s6104_s3 + $0xc0] sm:$0xff]   ;;  %v4849_v51 = vld [vmem:[%s6104_s3 + $0x88] sm:$0xff]  }
   0xc   :  { %4378 = vmatprep.subr.bf16.mxu1 %v5035_v0  ;;  %4406 = vmatprep.subr.bf16.mxu0 %v5035_v0  ;;  %v4850_v52 = vld [vmem:[%s6104_s3 + $0xc8] sm:$0xff]   ;;  %v4851_v53 = vld [vmem:[%s6104_s3 + $0x90] sm:$0xff]   ;;  %v4853_v55 = vld [vmem:[%s6104_s3 + $0x98] sm:$0xff]  }
   0xd   :  { %4392 = vmatprep.mubr.msk.bf16.mxu1 %vm5036_vm0, %v5035_v0  ;;  %4420 = vmatprep.mubr.msk.bf16.mxu0 %vm5036_vm0, %v5035_v0  ;;  %v4852_v54 = vld [vmem:[%s6104_s3 + $0xd0] sm:$0xff]   ;;  %v4854_v56 = vld [vmem:[%s6104_s3 + $0xd8] sm:$0xff]   ;;  %v4855_v57 = vld [vmem:[%s6104_s3 + $0xa0] sm:$0xff]  }
   0xe   :  { %v4856_v58 = vld [vmem:[%s6104_s3 + $0xe0] sm:$0xff]   ;;  %v4857_v59 = vld [vmem:[%s6104_s3 + $0xa8] sm:$0xff]   ;;  %v4859_v61 = vld [vmem:[%s6104_s3 + $0xb0] sm:$0xff]  }
   0xf   :  { %4379 = vmatpush3.bf16.msra.mxu1 %v4827_v9  ;;  %4407 = vmatpush3.bf16.msra.mxu0 %v4828_v10  ;;  %v4858_v60 = vld [vmem:[%s6104_s3 + $0xe8] sm:$0xff]   ;;  %v4860_v62 = vld [vmem:[%s6104_s3 + $0xf0] sm:$0xff]   ;;  %v4861_v63 = vld [vmem:[%s6104_s3 + $0xb8] sm:$0xff]  }
  0x10   :  { %4380 = vmatprep.subr.bf16.mxu1 %v5035_v0  ;;  %4408 = vmatprep.subr.bf16.mxu0 %v5035_v0  ;;  %v4862_v1 = vld [vmem:[%s6104_s3 + $0xf8] sm:$0xff]   ;;  %v3542_v2 = vld [vmem:[%s6106_s4] ss:$0 sm:$0xff]  ;;  %v3580_v3 = vld [vmem:[%s6106_s4 + $0x1] ss:$0 sm:$0xff] }
  0x13   :  { %4381 = vmatpush3.bf16.msra.mxu1 %v4829_v11  ;;  %4409 = vmatpush3.bf16.msra.mxu0 %v4830_v12 }
  0x14   :  { %4382 = vmatprep.subr.bf16.mxu1 %v5035_v0  ;;  %4410 = vmatprep.subr.bf16.mxu0 %v5035_v0 }
  0x17   :  { %4383 = vmatpush3.bf16.msra.mxu1 %v4831_v13  ;;  %4411 = vmatpush3.bf16.msra.mxu0 %v4832_v14 }
  0x18   :  { %4384 = vmatprep.subr.bf16.mxu1 %v5035_v0  ;;  %4412 = vmatprep.subr.bf16.mxu0 %v5035_v0 }
  0x1b   :  { %4385 = vmatpush3.bf16.msra.mxu1 %v4833_v15  ;;  %4413 = vmatpush3.bf16.msra.mxu0 %v4834_v16 }
  0x1c   :  { %4386 = vmatprep.subr.bf16.mxu1 %v5035_v0  ;;  %4414 = vmatprep.subr.bf16.mxu0 %v5035_v0 }
  0x1f   :  { %4387 = vmatpush3.bf16.msra.mxu1 %v4835_v17  ;;  %4415 = vmatpush3.bf16.msra.mxu0 %v4836_v18 }
  0x20   :  { %4388 = vmatprep.subr.bf16.mxu1 %v5035_v0  ;;  %4416 = vmatprep.subr.bf16.mxu0 %v5035_v0 }
  0x23   :  { %4389 = vmatpush3.bf16.msra.mxu1 %v4837_v19  ;;  %4417 = vmatpush3.bf16.msra.mxu0 %v4838_v20  ;;  %v3596_v20 = vld [vmem:[%s6105_s2 + $0x2] ss:$0 sm:$0xff] }
  0x24   :  { %4390 = vmatprep.subr.bf16.mxu1 %v5035_v0  ;;  %4418 = vmatprep.subr.bf16.mxu0 %v5035_v0 }
  0x27   :  { %4391 = vmatpush3.bf16.msra.mxu1 %v4839_v21  ;;  %4419 = vmatpush3.bf16.msra.mxu0 %v4840_v22 }
  0x28   :  { %4424 = vmatprep.subr.bf16.mxu1 %v5035_v0  ;;  %4452 = vmatprep.subr.bf16.mxu0 %v5035_v0 }
  0xdd   :  { %v101_v25 = vpop.f32.mrb[0].mxu1  ;;  %v297_v27 = vpop.f32.mrb[0].mxu0 }
  0xde   :  { %v102_v26 = vadd.f32 %v3537_v23, %v101_v25  ;;  %v4374_v28 = vpop.f32.mrb[1].mxu1  ;;  %v298_v29 = vadd.f32 %v3558_v24, %v297_v27  ;;  %v4402_v30 = vpop.f32.mrb[1].mxu0 }
  0xdf   :  { %v104_v31 = vpop.f32.mrb[2].mxu1  ;;  %v300_v33 = vpop.f32.mrb[2].mxu0 }
  0xe0   :  { %v105_v32 = vadd.f32 %v3537_v23, %v104_v31  ;;  %v4375_v34 = vpop.f32.mrb[3].mxu1  ;;  %v304_v35 = vmax.f32 %v298_v29, 0.0  ;;  %v301_v36 = vadd.f32 %v3558_v24, %v300_v33  ;;  %v4403_v37 = vpop.f32.mrb[3].mxu0  ;;  %v108_v38 = vmax.f32 %v102_v26, 0.0  ;;  %v3634_v24 = vld [vmem:[%s6105_s2 + $0x3] ss:$0 sm:$0xff] }
  0xe2   :  { %v109_v39 = vmax.f32 %v105_v32, 0.0  ;;  %v305_v40 = vmax.f32 %v301_v36, 0.0 }
  0xe4   :  { %v110_v42 = vpack.c.bf16 %v109_v39, %v108_v38  ;;  %v306_v44 = vpack.c.bf16 %v305_v40, %v304_v35 }
  0xe6   :  { %4393 = vmatmul.mubr.bf16.vlgmr.msra.gmra.mrb[4].mxu1 %v110_v42  ;;  %4421 = vmatmul.mubr.bf16.vlgmr.msra.gmra.mrb[4].mxu0 %v306_v44  ;;  %v4863_v42 = vld [vmem:[%s6102_s1 + $0x40] sm:$0xff]   ;;  %v4864_v44 = vld [vmem:[%s6102_s1 + $0x50] sm:$0xff]  }
  0xe7   :  { %4425 = vmatpush3.bf16.msra.mxu1 %v4841_v41  ;;  %4453 = vmatpush3.bf16.msra.mxu0 %v4842_v43 }
  0xe8   :  { %4426 = vmatprep.subr.bf16.mxu1 %v5035_v0  ;;  %4454 = vmatprep.subr.bf16.mxu0 %v5035_v0 }
  0xe9   :  { %4428 = vmatprep.mubr.msk.bf16.mxu1 %vm5036_vm0, %v5035_v0  ;;  %4456 = vmatprep.mubr.msk.bf16.mxu0 %vm5036_vm0, %v5035_v0 }
  0xeb   :  { %4427 = vmatpush3.bf16.msra.mxu1 %v4843_v45  ;;  %4455 = vmatpush3.bf16.msra.mxu0 %v4844_v46  ;;  %v4865_v46 = vld [vmem:[%s6102_s1 + $0x48] sm:$0xff]  }
  0xec   :  { %4432 = vmatprep.subr.bf16.mxu1 %v5035_v0  ;;  %4460 = vmatprep.subr.bf16.mxu0 %v5035_v0 }
  0xee   :  { %4429 = vmatmul.mubr.msk.bf16.vlgmr.msra.gmra.mrb[8].mxu1 %vm63_vm1, %v4845_v47  ;;  %4457 = vmatmul.mubr.msk.bf16.vlgmr.msra.gmra.mrb[8].mxu0 %vm63_vm1, %v4846_v48  ;;  %v4866_v47 = vld [vmem:[%s6102_s1 + $0x58] sm:$0xff]   ;;  %v4867_v48 = vld [vmem:[%s6103_s0 + $0x20] sm:$0xff]  }
  0xef   :  { %4433 = vmatpush3.bf16.msra.mxu1 %v4847_v49  ;;  %4461 = vmatpush3.bf16.msra.mxu0 %v4848_v50  ;;  %v4868_v49 = vld [vmem:[%s6103_s0 + $0x28] sm:$0xff]   ;;  %v4869_v50 = vld [vmem:[%s6104_s3 + $0x100] sm:$0xff]  }
  0xf0   :  { %4434 = vmatprep.subr.bf16.mxu1 %v5035_v0  ;;  %4462 = vmatprep.subr.bf16.mxu0 %v5035_v0 }
  0xf1   :  { %4448 = vmatprep.mubr.msk.bf16.mxu1 %vm5036_vm0, %v5035_v0  ;;  %4476 = vmatprep.mubr.msk.bf16.mxu0 %vm5036_vm0, %v5035_v0 }
  0xf3   :  { %4435 = vmatpush3.bf16.msra.mxu1 %v4849_v51  ;;  %4463 = vmatpush3.bf16.msra.mxu0 %v4850_v52  ;;  %v4870_v51 = vld [vmem:[%s6104_s3 + $0x140] sm:$0xff]   ;;  %v4871_v52 = vld [vmem:[%s6104_s3 + $0x108] sm:$0xff]  }
  0xf4   :  { %4436 = vmatprep.subr.bf16.mxu1 %v5035_v0  ;;  %4464 = vmatprep.subr.bf16.mxu0 %v5035_v0 }
  0xf7   :  { %4437 = vmatpush3.bf16.msra.mxu1 %v4851_v53  ;;  %4465 = vmatpush3.bf16.msra.mxu0 %v4852_v54  ;;  %v4872_v53 = vld [vmem:[%s6104_s3 + $0x148] sm:$0xff]   ;;  %v4873_v54 = vld [vmem:[%s6104_s3 + $0x110] sm:$0xff]  }
  0xf8   :  { %4438 = vmatprep.subr.bf16.mxu1 %v5035_v0  ;;  %4466 = vmatprep.subr.bf16.mxu0 %v5035_v0 }
  0xfb   :  { %4439 = vmatpush3.bf16.msra.mxu1 %v4853_v55  ;;  %4467 = vmatpush3.bf16.msra.mxu0 %v4854_v56  ;;  %v4874_v55 = vld [vmem:[%s6104_s3 + $0x150] sm:$0xff]   ;;  %v4875_v56 = vld [vmem:[%s6104_s3 + $0x118] sm:$0xff]  }
  0xfc   :  { %4440 = vmatprep.subr.bf16.mxu1 %v5035_v0  ;;  %4468 = vmatprep.subr.bf16.mxu0 %v5035_v0 }
  0xff   :  { %4441 = vmatpush3.bf16.msra.mxu1 %v4855_v57  ;;  %4469 = vmatpush3.bf16.msra.mxu0 %v4856_v58  ;;  %v4876_v57 = vld [vmem:[%s6104_s3 + $0x158] sm:$0xff]   ;;  %v4877_v58 = vld [vmem:[%s6104_s3 + $0x120] sm:$0xff]  }
 0x100   :  { %4442 = vmatprep.subr.bf16.mxu1 %v5035_v0  ;;  %4470 = vmatprep.subr.bf16.mxu0 %v5035_v0 }
 0x103   :  { %4443 = vmatpush3.bf16.msra.mxu1 %v4857_v59  ;;  %4471 = vmatpush3.bf16.msra.mxu0 %v4858_v60  ;;  %v4878_v59 = vld [vmem:[%s6104_s3 + $0x160] sm:$0xff]   ;;  %v4879_v60 = vld [vmem:[%s6104_s3 + $0x128] sm:$0xff]  }
 0x104   :  { %4444 = vmatprep.subr.bf16.mxu1 %v5035_v0  ;;  %4472 = vmatprep.subr.bf16.mxu0 %v5035_v0 }
 0x107   :  { %4445 = vmatpush3.bf16.msra.mxu1 %v4859_v61  ;;  %4473 = vmatpush3.bf16.msra.mxu0 %v4860_v62  ;;  %v4880_v61 = vld [vmem:[%s6104_s3 + $0x168] sm:$0xff]   ;;  %v4881_v62 = vld [vmem:[%s6104_s3 + $0x130] sm:$0xff]  }
 0x108   :  { %4446 = vmatprep.subr.bf16.mxu1 %v5035_v0  ;;  %4474 = vmatprep.subr.bf16.mxu0 %v5035_v0 }
 0x10b   :  { %4447 = vmatpush3.bf16.msra.mxu1 %v4861_v63  ;;  %4475 = vmatpush3.bf16.msra.mxu0 %v4862_v1  ;;  %v4882_v63 = vld [vmem:[%s6104_s3 + $0x170] sm:$0xff]   ;;  %v4883_v1 = vld [vmem:[%s6104_s3 + $0x138] sm:$0xff]  }
 0x10c   :  { %4480 = vmatprep.subr.bf16.mxu1 %v5035_v0  ;;  %4508 = vmatprep.subr.bf16.mxu0 %v5035_v0 }
 0x1b9   :  { %v216_v4 = vpop.f32.mrb[4].mxu1  ;;  %v414_v6 = vpop.f32.mrb[4].mxu0 }
 0x1ba   :  { %v217_v5 = vadd.f32 %v3542_v2, %v216_v4  ;;  %v4394_v7 = vpop.f32.mrb[5].mxu1  ;;  %v415_v8 = vadd.f32 %v3580_v3, %v414_v6  ;;  %v4422_v9 = vpop.f32.mrb[5].mxu0  ;;  %v3656_v4 = vld [vmem:[%s6106_s4 + $0x3] ss:$0 sm:$0xff] }
 0x1bb   :  { %v219_v10 = vpop.f32.mrb[6].mxu1  ;;  %v417_v13 = vpop.f32.mrb[6].mxu0 }
 0x1bc   :  { %v223_v11 = vmax.f32 %v217_v5, 0.0  ;;  %v220_v12 = vadd.f32 %v3542_v2, %v219_v10  ;;  %v4395_v14 = vpop.f32.mrb[7].mxu1  ;;  %v418_v15 = vadd.f32 %v3580_v3, %v417_v13  ;;  %v4423_v16 = vpop.f32.mrb[7].mxu0  ;;  %v421_v18 = vmax.f32 %v415_v8, 0.0  ;;  %v4884_v2 = vld [vmem:[%s6104_s3 + $0x178] sm:$0xff]  }
 0x1bd   :  { %v3618_v3 = vld [vmem:[%s6106_s4 + $0x2] ss:$0 sm:$0xff] }
 0x1be   :  { %v225_v17 = vmax.f32 %v223_v11, 0.0  ;;  %v224_v19 = vmax.f32 %v220_v12, 0.0  ;;  %v422_v23 = vmax.f32 %v418_v15, 0.0 }
 0x1c0   :  { %v5297_v21 = vmax.f32 %v225_v17, %v421_v18  ;;  %v226_v22 = vmax.f32 %v224_v19, 0.0 }
 0x1c1   :  { %v495_v25 = vpop.f32.mrb[8].mxu1  ;;  %v693_v28 = vpop.f32.mrb[8].mxu0 }
 0x1c2   :  { %v5302_v26 = vmax.f32 %v226_v22, %v422_v23  ;;  %v496_v27 = vadd.f32 %v3596_v20, %v495_v25  ;;  %v4430_v29 = vpop.f32.mrb[9].mxu1  ;;  %v694_v30 = vadd.f32 %v3634_v24, %v693_v28  ;;  %v4458_v31 = vpop.f32.mrb[9].mxu0  ;;  %v3672_v22 = vld [vmem:[%s6105_s2 + $0x4] ss:$0 sm:$0xff] }
 0x1c3   :  { %v498_v32 = vpop.f32.mrb[10].mxu1  ;;  %v696_v34 = vpop.f32.mrb[10].mxu0 }
 0x1c4   :  { %v499_v33 = vadd.f32 %v3596_v20, %v498_v32  ;;  %v4431_v35 = vpop.f32.mrb[11].mxu1  ;;  %v700_v36 = vmax.f32 %v694_v30, 0.0  ;;  %v697_v37 = vadd.f32 %v3634_v24, %v696_v34  ;;  %v4459_v38 = vpop.f32.mrb[11].mxu0  ;;  %v502_v39 = vmax.f32 %v496_v27, 0.0  ;;  %v3710_v27 = vld [vmem:[%s6105_s2 + $0x5] ss:$0 sm:$0xff] }
 0x1c6   :  { %v503_v40 = vmax.f32 %v499_v33, 0.0  ;;  %v701_v41 = vmax.f32 %v697_v37, 0.0 }
 0x1c8   :  { %v504_v43 = vpack.c.bf16 %v503_v40, %v502_v39  ;;  %v702_v45 = vpack.c.bf16 %v701_v41, %v700_v36 }
 0x1ca   :  { %4449 = vmatmul.mubr.bf16.vlgmr.msra.gmra.mrb[12].mxu1 %v504_v43  ;;  %4477 = vmatmul.mubr.bf16.vlgmr.msra.gmra.mrb[12].mxu0 %v702_v45  ;;  %v4885_v43 = vld [vmem:[%s6102_s1 + $0x60] sm:$0xff]   ;;  %v4886_v45 = vld [vmem:[%s6102_s1 + $0x70] sm:$0xff]  }
 0x1cb   :  { %4481 = vmatpush3.bf16.msra.mxu1 %v4863_v42  ;;  %4509 = vmatpush3.bf16.msra.mxu0 %v4864_v44 }
 0x1cc   :  { %4482 = vmatprep.subr.bf16.mxu1 %v5035_v0  ;;  %4510 = vmatprep.subr.bf16.mxu0 %v5035_v0 }
 0x1cd   :  { %4484 = vmatprep.mubr.msk.bf16.mxu1 %vm5036_vm0, %v5035_v0  ;;  %4512 = vmatprep.mubr.msk.bf16.mxu0 %vm5036_vm0, %v5035_v0 }
 0x1cf   :  { %4483 = vmatpush3.bf16.msra.mxu1 %v4865_v46  ;;  %4511 = vmatpush3.bf16.msra.mxu0 %v4866_v47  ;;  %v4887_v47 = vld [vmem:[%s6102_s1 + $0x68] sm:$0xff]  }
 0x1d0   :  { %4488 = vmatprep.subr.bf16.mxu1 %v5035_v0  ;;  %4516 = vmatprep.subr.bf16.mxu0 %v5035_v0 }
 0x1d2   :  { %4485 = vmatmul.mubr.msk.bf16.vlgmr.msra.gmra.mrb[16].mxu1 %vm63_vm1, %v4867_v48  ;;  %4513 = vmatmul.mubr.msk.bf16.vlgmr.msra.gmra.mrb[16].mxu0 %vm63_vm1, %v4868_v49  ;;  %v4888_v48 = vld [vmem:[%s6102_s1 + $0x78] sm:$0xff]   ;;  %v4889_v49 = vld [vmem:[%s6103_s0 + $0x30] sm:$0xff]  }
 0x1d3   :  { %4489 = vmatpush3.bf16.msra.mxu1 %v4869_v50  ;;  %4517 = vmatpush3.bf16.msra.mxu0 %v4870_v51  ;;  %v4890_v50 = vld [vmem:[%s6103_s0 + $0x38] sm:$0xff]   ;;  %v4891_v51 = vld [vmem:[%s6104_s3 + $0x180] sm:$0xff]  }
 0x1d4   :  { %4490 = vmatprep.subr.bf16.mxu1 %v5035_v0  ;;  %4518 = vmatprep.subr.bf16.mxu0 %v5035_v0 }
 0x1d5   :  { %4504 = vmatprep.mubr.msk.bf16.mxu1 %vm5036_vm0, %v5035_v0  ;;  %4532 = vmatprep.mubr.msk.bf16.mxu0 %vm5036_vm0, %v5035_v0 }
 0x1d7   :  { %4491 = vmatpush3.bf16.msra.mxu1 %v4871_v52  ;;  %4519 = vmatpush3.bf16.msra.mxu0 %v4872_v53  ;;  %v4892_v52 = vld [vmem:[%s6104_s3 + $0x1c0] sm:$0xff]   ;;  %v4893_v53 = vld [vmem:[%s6104_s3 + $0x188] sm:$0xff]  }
 0x1d8   :  { %4492 = vmatprep.subr.bf16.mxu1 %v5035_v0  ;;  %4520 = vmatprep.subr.bf16.mxu0 %v5035_v0 }
 0x1db   :  { %4493 = vmatpush3.bf16.msra.mxu1 %v4873_v54  ;;  %4521 = vmatpush3.bf16.msra.mxu0 %v4874_v55  ;;  %v4894_v54 = vld [vmem:[%s6104_s3 + $0x1c8] sm:$0xff]   ;;  %v4895_v55 = vld [vmem:[%s6104_s3 + $0x190] sm:$0xff]  }
 0x1dc   :  { %4494 = vmatprep.subr.bf16.mxu1 %v5035_v0  ;;  %4522 = vmatprep.subr.bf16.mxu0 %v5035_v0 }
 0x1df   :  { %4495 = vmatpush3.bf16.msra.mxu1 %v4875_v56  ;;  %4523 = vmatpush3.bf16.msra.mxu0 %v4876_v57  ;;  %v4896_v56 = vld [vmem:[%s6104_s3 + $0x1d0] sm:$0xff]   ;;  %v4897_v57 = vld [vmem:[%s6104_s3 + $0x198] sm:$0xff]  }
 0x1e0   :  { %4496 = vmatprep.subr.bf16.mxu1 %v5035_v0  ;;  %4524 = vmatprep.subr.bf16.mxu0 %v5035_v0 }
 0x1e3   :  { %4497 = vmatpush3.bf16.msra.mxu1 %v4877_v58  ;;  %4525 = vmatpush3.bf16.msra.mxu0 %v4878_v59  ;;  %v4898_v58 = vld [vmem:[%s6104_s3 + $0x1d8] sm:$0xff]   ;;  %v4899_v59 = vld [vmem:[%s6104_s3 + $0x1a0] sm:$0xff]  }
 0x1e4   :  { %4498 = vmatprep.subr.bf16.mxu1 %v5035_v0  ;;  %4526 = vmatprep.subr.bf16.mxu0 %v5035_v0 }
 0x1e7   :  { %4499 = vmatpush3.bf16.msra.mxu1 %v4879_v60  ;;  %4527 = vmatpush3.bf16.msra.mxu0 %v4880_v61  ;;  %v4900_v60 = vld [vmem:[%s6104_s3 + $0x1e0] sm:$0xff]   ;;  %v4901_v61 = vld [vmem:[%s6104_s3 + $0x1a8] sm:$0xff]  }
 0x1e8   :  { %4500 = vmatprep.subr.bf16.mxu1 %v5035_v0  ;;  %4528 = vmatprep.subr.bf16.mxu0 %v5035_v0 }
 0x1eb   :  { %4501 = vmatpush3.bf16.msra.mxu1 %v4881_v62  ;;  %4529 = vmatpush3.bf16.msra.mxu0 %v4882_v63  ;;  %v4902_v62 = vld [vmem:[%s6104_s3 + $0x1e8] sm:$0xff]   ;;  %v4903_v63 = vld [vmem:[%s6104_s3 + $0x1b0] sm:$0xff]  }
 0x1ec   :  { %4502 = vmatprep.subr.bf16.mxu1 %v5035_v0  ;;  %4530 = vmatprep.subr.bf16.mxu0 %v5035_v0 }
 0x1ef   :  { %4503 = vmatpush3.bf16.msra.mxu1 %v4883_v1  ;;  %4531 = vmatpush3.bf16.msra.mxu0 %v4884_v2  ;;  %v4904_v1 = vld [vmem:[%s6104_s3 + $0x1f0] sm:$0xff]   ;;  %v4905_v2 = vld [vmem:[%s6104_s3 + $0x1b8] sm:$0xff]  }
 0x1f0   :  { %4536 = vmatprep.subr.bf16.mxu1 %v5035_v0  ;;  %4564 = vmatprep.subr.bf16.mxu0 %v5035_v0 }
 0x29d   :  { %v612_v5 = vpop.f32.mrb[12].mxu1  ;;  %v810_v7 = vpop.f32.mrb[12].mxu0 }
 0x29e   :  { %v613_v6 = vadd.f32 %v3618_v3, %v612_v5  ;;  %v4450_v8 = vpop.f32.mrb[13].mxu1  ;;  %v811_v9 = vadd.f32 %v3656_v4, %v810_v7  ;;  %v4478_v10 = vpop.f32.mrb[13].mxu0  ;;  %v3732_v5 = vld [vmem:[%s6106_s4 + $0x5] ss:$0 sm:$0xff] }
 0x29f   :  { %v615_v11 = vpop.f32.mrb[14].mxu1  ;;  %v813_v14 = vpop.f32.mrb[14].mxu0 }
 0x2a0   :  { %v619_v12 = vmax.f32 %v613_v6, 0.0  ;;  %v616_v13 = vadd.f32 %v3618_v3, %v615_v11  ;;  %v4451_v15 = vpop.f32.mrb[15].mxu1  ;;  %v814_v16 = vadd.f32 %v3656_v4, %v813_v14  ;;  %v4479_v17 = vpop.f32.mrb[15].mxu0  ;;  %v817_v19 = vmax.f32 %v811_v9, 0.0  ;;  %v4906_v3 = vld [vmem:[%s6104_s3 + $0x1f8] sm:$0xff]  }
 0x2a1   :  { %v3694_v4 = vld [vmem:[%s6106_s4 + $0x4] ss:$0 sm:$0xff] }
 0x2a2   :  { %v621_v18 = vmax.f32 %v5297_v21, %v619_v12  ;;  %v620_v20 = vmax.f32 %v616_v13, 0.0  ;;  %v818_v25 = vmax.f32 %v814_v16, 0.0 }
 0x2a4   :  { %v5410_v23 = vmax.f32 %v621_v18, %v817_v19  ;;  %v622_v24 = vmax.f32 %v5302_v26, %v620_v20 }
 0x2a5   :  { %v891_v28 = vpop.f32.mrb[16].mxu1  ;;  %v1089_v21 = vpop.f32.mrb[16].mxu0 }
 0x2a6   :  { %v5416_v29 = vmax.f32 %v622_v24, %v818_v25  ;;  %v892_v30 = vadd.f32 %v3672_v22, %v891_v28  ;;  %v4486_v31 = vpop.f32.mrb[17].mxu1  ;;  %v1090_v32 = vadd.f32 %v3710_v27, %v1089_v21  ;;  %v4514_v33 = vpop.f32.mrb[17].mxu0  ;;  %v3748_v24 = vld [vmem:[%s6105_s2 + $0x6] ss:$0 sm:$0xff] }
 0x2a7   :  { %v894_v34 = vpop.f32.mrb[18].mxu1  ;;  %v1092_v36 = vpop.f32.mrb[18].mxu0 }
 0x2a8   :  { %v895_v35 = vadd.f32 %v3672_v22, %v894_v34  ;;  %v4487_v37 = vpop.f32.mrb[19].mxu1  ;;  %v1096_v38 = vmax.f32 %v1090_v32, 0.0  ;;  %v1093_v39 = vadd.f32 %v3710_v27, %v1092_v36  ;;  %v4515_v26 = vpop.f32.mrb[19].mxu0  ;;  %v898_v40 = vmax.f32 %v892_v30, 0.0  ;;  %v3786_v30 = vld [vmem:[%s6105_s2 + $0x7] ss:$0 sm:$0xff] }
 0x2aa   :  { %v899_v41 = vmax.f32 %v895_v35, 0.0  ;;  %v1097_v42 = vmax.f32 %v1093_v39, 0.0 }
 0x2ac   :  { %v900_v44 = vpack.c.bf16 %v899_v41, %v898_v40  ;;  %v1098_v46 = vpack.c.bf16 %v1097_v42, %v1096_v38 }
 0x2ae   :  { %4505 = vmatmul.mubr.bf16.vlgmr.msra.gmra.mrb[20].mxu1 %v900_v44  ;;  %4533 = vmatmul.mubr.bf16.vlgmr.msra.gmra.mrb[20].mxu0 %v1098_v46  ;;  %v4907_v44 = vld [vmem:[%s6102_s1 + $0x80] sm:$0xff]   ;;  %v4908_v46 = vld [vmem:[%s6102_s1 + $0x90] sm:$0xff]  }
 0x2af   :  { %4537 = vmatpush3.bf16.msra.mxu1 %v4885_v43  ;;  %4565 = vmatpush3.bf16.msra.mxu0 %v4886_v45 }
 0x2b0   :  { %4538 = vmatprep.subr.bf16.mxu1 %v5035_v0  ;;  %4566 = vmatprep.subr.bf16.mxu0 %v5035_v0 }
 0x2b1   :  { %4540 = vmatprep.mubr.msk.bf16.mxu1 %vm5036_vm0, %v5035_v0  ;;  %4568 = vmatprep.mubr.msk.bf16.mxu0 %vm5036_vm0, %v5035_v0 }
 0x2b3   :  { %4539 = vmatpush3.bf16.msra.mxu1 %v4887_v47  ;;  %4567 = vmatpush3.bf16.msra.mxu0 %v4888_v48  ;;  %v4909_v48 = vld [vmem:[%s6102_s1 + $0x88] sm:$0xff]  }
 0x2b4   :  { %4544 = vmatprep.subr.bf16.mxu1 %v5035_v0  ;;  %4572 = vmatprep.subr.bf16.mxu0 %v5035_v0 }
 0x2b6   :  { %4541 = vmatmul.mubr.msk.bf16.vlgmr.msra.gmra.mrb[24].mxu1 %vm63_vm1, %v4889_v49  ;;  %4569 = vmatmul.mubr.msk.bf16.vlgmr.msra.gmra.mrb[24].mxu0 %vm63_vm1, %v4890_v50  ;;  %v4910_v49 = vld [vmem:[%s6102_s1 + $0x98] sm:$0xff]   ;;  %v4911_v50 = vld [vmem:[%s6103_s0 + $0x40] sm:$0xff]  }
 0x2b7   :  { %4545 = vmatpush3.bf16.msra.mxu1 %v4891_v51  ;;  %4573 = vmatpush3.bf16.msra.mxu0 %v4892_v52  ;;  %v4912_v51 = vld [vmem:[%s6103_s0 + $0x48] sm:$0xff]   ;;  %v4913_v52 = vld [vmem:[%s6104_s3 + $0x200] sm:$0xff]  }
 0x2b8   :  { %4546 = vmatprep.subr.bf16.mxu1 %v5035_v0  ;;  %4574 = vmatprep.subr.bf16.mxu0 %v5035_v0 }
 0x2b9   :  { %4560 = vmatprep.mubr.msk.bf16.mxu1 %vm5036_vm0, %v5035_v0  ;;  %4588 = vmatprep.mubr.msk.bf16.mxu0 %vm5036_vm0, %v5035_v0 }
 0x2bb   :  { %4547 = vmatpush3.bf16.msra.mxu1 %v4893_v53  ;;  %4575 = vmatpush3.bf16.msra.mxu0 %v4894_v54  ;;  %v4914_v53 = vld [vmem:[%s6104_s3 + $0x240] sm:$0xff]   ;;  %v4915_v54 = vld [vmem:[%s6104_s3 + $0x208] sm:$0xff]  }
 0x2bc   :  { %4548 = vmatprep.subr.bf16.mxu1 %v5035_v0  ;;  %4576 = vmatprep.subr.bf16.mxu0 %v5035_v0 }
 0x2bf   :  { %4549 = vmatpush3.bf16.msra.mxu1 %v4895_v55  ;;  %4577 = vmatpush3.bf16.msra.mxu0 %v4896_v56  ;;  %v4916_v55 = vld [vmem:[%s6104_s3 + $0x248] sm:$0xff]   ;;  %v4917_v56 = vld [vmem:[%s6104_s3 + $0x210] sm:$0xff]  }
 0x2c0   :  { %4550 = vmatprep.subr.bf16.mxu1 %v5035_v0  ;;  %4578 = vmatprep.subr.bf16.mxu0 %v5035_v0 }
 0x2c3   :  { %4551 = vmatpush3.bf16.msra.mxu1 %v4897_v57  ;;  %4579 = vmatpush3.bf16.msra.mxu0 %v4898_v58  ;;  %v4918_v57 = vld [vmem:[%s6104_s3 + $0x250] sm:$0xff]   ;;  %v4919_v58 = vld [vmem:[%s6104_s3 + $0x218] sm:$0xff]  }
 0x2c4   :  { %4552 = vmatprep.subr.bf16.mxu1 %v5035_v0  ;;  %4580 = vmatprep.subr.bf16.mxu0 %v5035_v0 }
 0x2c7   :  { %4553 = vmatpush3.bf16.msra.mxu1 %v4899_v59  ;;  %4581 = vmatpush3.bf16.msra.mxu0 %v4900_v60  ;;  %v4920_v59 = vld [vmem:[%s6104_s3 + $0x258] sm:$0xff]   ;;  %v4921_v60 = vld [vmem:[%s6104_s3 + $0x220] sm:$0xff]  }
 0x2c8   :  { %4554 = vmatprep.subr.bf16.mxu1 %v5035_v0  ;;  %4582 = vmatprep.subr.bf16.mxu0 %v5035_v0 }
 0x2cb   :  { %4555 = vmatpush3.bf16.msra.mxu1 %v4901_v61  ;;  %4583 = vmatpush3.bf16.msra.mxu0 %v4902_v62  ;;  %v4922_v61 = vld [vmem:[%s6104_s3 + $0x260] sm:$0xff]   ;;  %v4923_v62 = vld [vmem:[%s6104_s3 + $0x228] sm:$0xff]  }
 0x2cc   :  { %4556 = vmatprep.subr.bf16.mxu1 %v5035_v0  ;;  %4584 = vmatprep.subr.bf16.mxu0 %v5035_v0 }
 0x2cf   :  { %4557 = vmatpush3.bf16.msra.mxu1 %v4903_v63  ;;  %4585 = vmatpush3.bf16.msra.mxu0 %v4904_v1  ;;  %v4924_v63 = vld [vmem:[%s6104_s3 + $0x268] sm:$0xff]   ;;  %v4925_v1 = vld [vmem:[%s6104_s3 + $0x230] sm:$0xff]  }
 0x2d0   :  { %4558 = vmatprep.subr.bf16.mxu1 %v5035_v0  ;;  %4586 = vmatprep.subr.bf16.mxu0 %v5035_v0 }
 0x2d3   :  { %4559 = vmatpush3.bf16.msra.mxu1 %v4905_v2  ;;  %4587 = vmatpush3.bf16.msra.mxu0 %v4906_v3  ;;  %v4926_v2 = vld [vmem:[%s6104_s3 + $0x270] sm:$0xff]   ;;  %v4927_v3 = vld [vmem:[%s6104_s3 + $0x238] sm:$0xff]  }
 0x2d4   :  { %4592 = vmatprep.subr.bf16.mxu1 %v5035_v0  ;;  %4620 = vmatprep.subr.bf16.mxu0 %v5035_v0 }
 0x381   :  { %v1008_v6 = vpop.f32.mrb[20].mxu1  ;;  %v1206_v8 = vpop.f32.mrb[20].mxu0 }
 0x382   :  { %v1009_v7 = vadd.f32 %v3694_v4, %v1008_v6  ;;  %v4506_v9 = vpop.f32.mrb[21].mxu1  ;;  %v1207_v10 = vadd.f32 %v3732_v5, %v1206_v8  ;;  %v4534_v11 = vpop.f32.mrb[21].mxu0  ;;  %v3808_v6 = vld [vmem:[%s6106_s4 + $0x7] ss:$0 sm:$0xff] }
 0x383   :  { %v1011_v12 = vpop.f32.mrb[22].mxu1  ;;  %v1209_v15 = vpop.f32.mrb[22].mxu0 }
 0x384   :  { %v1015_v13 = vmax.f32 %v1009_v7, 0.0  ;;  %v1012_v14 = vadd.f32 %v3694_v4, %v1011_v12  ;;  %v4507_v16 = vpop.f32.mrb[23].mxu1  ;;  %v1210_v17 = vadd.f32 %v3732_v5, %v1209_v15  ;;  %v4535_v18 = vpop.f32.mrb[23].mxu0  ;;  %v1213_v20 = vmax.f32 %v1207_v10, 0.0  ;;  %v4928_v4 = vld [vmem:[%s6104_s3 + $0x278] sm:$0xff]  }
 0x385   :  { %v3770_v5 = vld [vmem:[%s6106_s4 + $0x6] ss:$0 sm:$0xff] }
 0x386   :  { %v1017_v19 = vmax.f32 %v5410_v23, %v1015_v13  ;;  %v1016_v22 = vmax.f32 %v1012_v14, 0.0  ;;  %v1214_v28 = vmax.f32 %v1210_v17, 0.0 }
 0x388   :  { %v5524_v25 = vmax.f32 %v1017_v19, %v1213_v20  ;;  %v1018_v27 = vmax.f32 %v5416_v29, %v1016_v22 }
 0x389   :  { %v1287_v21 = vpop.f32.mrb[24].mxu1  ;;  %v1485_v23 = vpop.f32.mrb[24].mxu0 }
 0x38a   :  { %v5530_v31 = vmax.f32 %v1018_v27, %v1214_v28  ;;  %v1288_v32 = vadd.f32 %v3748_v24, %v1287_v21  ;;  %v4542_v33 = vpop.f32.mrb[25].mxu1  ;;  %v1486_v34 = vadd.f32 %v3786_v30, %v1485_v23  ;;  %v4570_v35 = vpop.f32.mrb[25].mxu0  ;;  %v3824_v27 = vld [vmem:[%s6105_s2 + $0x8] ss:$0 sm:$0xff] }
 0x38b   :  { %v1290_v36 = vpop.f32.mrb[26].mxu1  ;;  %v1488_v38 = vpop.f32.mrb[26].mxu0 }
 0x38c   :  { %v1291_v37 = vadd.f32 %v3748_v24, %v1290_v36  ;;  %v4543_v39 = vpop.f32.mrb[27].mxu1  ;;  %v1492_v26 = vmax.f32 %v1486_v34, 0.0  ;;  %v1489_v40 = vadd.f32 %v3786_v30, %v1488_v38  ;;  %v4571_v29 = vpop.f32.mrb[27].mxu0  ;;  %v1294_v41 = vmax.f32 %v1288_v32, 0.0  ;;  %v3862_v32 = vld [vmem:[%s6105_s2 + $0x9] ss:$0 sm:$0xff] }
 0x38e   :  { %v1295_v42 = vmax.f32 %v1291_v37, 0.0  ;;  %v1493_v43 = vmax.f32 %v1489_v40, 0.0 }
 0x390   :  { %v1296_v45 = vpack.c.bf16 %v1295_v42, %v1294_v41  ;;  %v1494_v47 = vpack.c.bf16 %v1493_v43, %v1492_v26 }
 0x392   :  { %4561 = vmatmul.mubr.bf16.vlgmr.msra.gmra.mrb[28].mxu1 %v1296_v45  ;;  %4589 = vmatmul.mubr.bf16.vlgmr.msra.gmra.mrb[28].mxu0 %v1494_v47  ;;  %v4929_v45 = vld [vmem:[%s6102_s1 + $0xa0] sm:$0xff]   ;;  %v4930_v47 = vld [vmem:[%s6102_s1 + $0xb0] sm:$0xff]  }
 0x393   :  { %4593 = vmatpush3.bf16.msra.mxu1 %v4907_v44  ;;  %4621 = vmatpush3.bf16.msra.mxu0 %v4908_v46 }
 0x394   :  { %4594 = vmatprep.subr.bf16.mxu1 %v5035_v0  ;;  %4622 = vmatprep.subr.bf16.mxu0 %v5035_v0 }
 0x395   :  { %4596 = vmatprep.mubr.msk.bf16.mxu1 %vm5036_vm0, %v5035_v0  ;;  %4624 = vmatprep.mubr.msk.bf16.mxu0 %vm5036_vm0, %v5035_v0 }
 0x397   :  { %4595 = vmatpush3.bf16.msra.mxu1 %v4909_v48  ;;  %4623 = vmatpush3.bf16.msra.mxu0 %v4910_v49  ;;  %v4931_v49 = vld [vmem:[%s6102_s1 + $0xa8] sm:$0xff]  }
 0x398   :  { %4600 = vmatprep.subr.bf16.mxu1 %v5035_v0  ;;  %4628 = vmatprep.subr.bf16.mxu0 %v5035_v0 }
 0x39a   :  { %4597 = vmatmul.mubr.msk.bf16.vlgmr.msra.gmra.mrb[32].mxu1 %vm63_vm1, %v4911_v50  ;;  %4625 = vmatmul.mubr.msk.bf16.vlgmr.msra.gmra.mrb[32].mxu0 %vm63_vm1, %v4912_v51  ;;  %v4932_v50 = vld [vmem:[%s6102_s1 + $0xb8] sm:$0xff]   ;;  %v4933_v51 = vld [vmem:[%s6103_s0 + $0x50] sm:$0xff]  }
 0x39b   :  { %4601 = vmatpush3.bf16.msra.mxu1 %v4913_v52  ;;  %4629 = vmatpush3.bf16.msra.mxu0 %v4914_v53  ;;  %v4934_v52 = vld [vmem:[%s6103_s0 + $0x58] sm:$0xff]   ;;  %v4935_v53 = vld [vmem:[%s6104_s3 + $0x280] sm:$0xff]  }
 0x39c   :  { %4602 = vmatprep.subr.bf16.mxu1 %v5035_v0  ;;  %4630 = vmatprep.subr.bf16.mxu0 %v5035_v0 }
 0x39d   :  { %4616 = vmatprep.mubr.msk.bf16.mxu1 %vm5036_vm0, %v5035_v0  ;;  %4644 = vmatprep.mubr.msk.bf16.mxu0 %vm5036_vm0, %v5035_v0 }
 0x39f   :  { %4603 = vmatpush3.bf16.msra.mxu1 %v4915_v54  ;;  %4631 = vmatpush3.bf16.msra.mxu0 %v4916_v55  ;;  %v4936_v54 = vld [vmem:[%s6104_s3 + $0x2c0] sm:$0xff]   ;;  %v4937_v55 = vld [vmem:[%s6104_s3 + $0x288] sm:$0xff]  }
 0x3a0   :  { %4604 = vmatprep.subr.bf16.mxu1 %v5035_v0  ;;  %4632 = vmatprep.subr.bf16.mxu0 %v5035_v0 }
 0x3a3   :  { %4605 = vmatpush3.bf16.msra.mxu1 %v4917_v56  ;;  %4633 = vmatpush3.bf16.msra.mxu0 %v4918_v57  ;;  %v4938_v56 = vld [vmem:[%s6104_s3 + $0x2c8] sm:$0xff]   ;;  %v4939_v57 = vld [vmem:[%s6104_s3 + $0x290] sm:$0xff]  }
 0x3a4   :  { %4606 = vmatprep.subr.bf16.mxu1 %v5035_v0  ;;  %4634 = vmatprep.subr.bf16.mxu0 %v5035_v0 }
 0x3a7   :  { %4607 = vmatpush3.bf16.msra.mxu1 %v4919_v58  ;;  %4635 = vmatpush3.bf16.msra.mxu0 %v4920_v59  ;;  %v4940_v58 = vld [vmem:[%s6104_s3 + $0x2d0] sm:$0xff]   ;;  %v4941_v59 = vld [vmem:[%s6104_s3 + $0x298] sm:$0xff]  }
 0x3a8   :  { %4608 = vmatprep.subr.bf16.mxu1 %v5035_v0  ;;  %4636 = vmatprep.subr.bf16.mxu0 %v5035_v0 }
 0x3ab   :  { %4609 = vmatpush3.bf16.msra.mxu1 %v4921_v60  ;;  %4637 = vmatpush3.bf16.msra.mxu0 %v4922_v61  ;;  %v4942_v60 = vld [vmem:[%s6104_s3 + $0x2d8] sm:$0xff]   ;;  %v4943_v61 = vld [vmem:[%s6104_s3 + $0x2a0] sm:$0xff]  }
 0x3ac   :  { %4610 = vmatprep.subr.bf16.mxu1 %v5035_v0  ;;  %4638 = vmatprep.subr.bf16.mxu0 %v5035_v0 }
 0x3af   :  { %4611 = vmatpush3.bf16.msra.mxu1 %v4923_v62  ;;  %4639 = vmatpush3.bf16.msra.mxu0 %v4924_v63  ;;  %v4944_v62 = vld [vmem:[%s6104_s3 + $0x2e0] sm:$0xff]   ;;  %v4945_v63 = vld [vmem:[%s6104_s3 + $0x2a8] sm:$0xff]  }
 0x3b0   :  { %4612 = vmatprep.subr.bf16.mxu1 %v5035_v0  ;;  %4640 = vmatprep.subr.bf16.mxu0 %v5035_v0 }
 0x3b3   :  { %4613 = vmatpush3.bf16.msra.mxu1 %v4925_v1  ;;  %4641 = vmatpush3.bf16.msra.mxu0 %v4926_v2  ;;  %v4946_v1 = vld [vmem:[%s6104_s3 + $0x2e8] sm:$0xff]   ;;  %v4947_v2 = vld [vmem:[%s6104_s3 + $0x2b0] sm:$0xff]  }
 0x3b4   :  { %4614 = vmatprep.subr.bf16.mxu1 %v5035_v0  ;;  %4642 = vmatprep.subr.bf16.mxu0 %v5035_v0 }
 0x3b7   :  { %4615 = vmatpush3.bf16.msra.mxu1 %v4927_v3  ;;  %4643 = vmatpush3.bf16.msra.mxu0 %v4928_v4  ;;  %v4948_v3 = vld [vmem:[%s6104_s3 + $0x2f0] sm:$0xff]   ;;  %v4949_v4 = vld [vmem:[%s6104_s3 + $0x2b8] sm:$0xff]  }
 0x3b8   :  { %4648 = vmatprep.subr.bf16.mxu1 %v5035_v0  ;;  %4676 = vmatprep.subr.bf16.mxu0 %v5035_v0 }
 0x465   :  { %v1404_v7 = vpop.f32.mrb[28].mxu1  ;;  %v1602_v9 = vpop.f32.mrb[28].mxu0 }
 0x466   :  { %v1405_v8 = vadd.f32 %v3770_v5, %v1404_v7  ;;  %v4562_v10 = vpop.f32.mrb[29].mxu1  ;;  %v1603_v11 = vadd.f32 %v3808_v6, %v1602_v9  ;;  %v4590_v12 = vpop.f32.mrb[29].mxu0  ;;  %v3884_v7 = vld [vmem:[%s6106_s4 + $0x9] ss:$0 sm:$0xff] }
 0x467   :  { %v1407_v13 = vpop.f32.mrb[30].mxu1  ;;  %v1605_v16 = vpop.f32.mrb[30].mxu0 }
 0x468   :  { %v1411_v14 = vmax.f32 %v1405_v8, 0.0  ;;  %v1408_v15 = vadd.f32 %v3770_v5, %v1407_v13  ;;  %v4563_v17 = vpop.f32.mrb[31].mxu1  ;;  %v1606_v18 = vadd.f32 %v3808_v6, %v1605_v16  ;;  %v4591_v19 = vpop.f32.mrb[31].mxu0  ;;  %v1609_v22 = vmax.f32 %v1603_v11, 0.0  ;;  %v4950_v5 = vld [vmem:[%s6104_s3 + $0x2f8] sm:$0xff]  }
 0x469   :  { %v3846_v6 = vld [vmem:[%s6106_s4 + $0x8] ss:$0 sm:$0xff] }
 0x46a   :  { %v1413_v20 = vmax.f32 %v5524_v25, %v1411_v14  ;;  %v1412_v24 = vmax.f32 %v1408_v15, 0.0  ;;  %v1610_v21 = vmax.f32 %v1606_v18, 0.0 }
 0x46c   :  { %v5638_v28 = vmax.f32 %v1413_v20, %v1609_v22  ;;  %v1414_v30 = vmax.f32 %v5530_v31, %v1412_v24 }
 0x46d   :  { %v1683_v23 = vpop.f32.mrb[32].mxu1  ;;  %v1881_v25 = vpop.f32.mrb[32].mxu0 }
 0x46e   :  { %v5644_v33 = vmax.f32 %v1414_v30, %v1610_v21  ;;  %v1684_v34 = vadd.f32 %v3824_v27, %v1683_v23  ;;  %v4598_v35 = vpop.f32.mrb[33].mxu1  ;;  %v1882_v36 = vadd.f32 %v3862_v32, %v1881_v25  ;;  %v4626_v37 = vpop.f32.mrb[33].mxu0  ;;  %v3900_v30 = vld [vmem:[%s6105_s2 + $0xa] ss:$0 sm:$0xff] }
 0x46f   :  { %v1686_v38 = vpop.f32.mrb[34].mxu1  ;;  %v1884_v26 = vpop.f32.mrb[34].mxu0 }
 0x470   :  { %v1687_v39 = vadd.f32 %v3824_v27, %v1686_v38  ;;  %v4599_v40 = vpop.f32.mrb[35].mxu1  ;;  %v1888_v29 = vmax.f32 %v1882_v36, 0.0  ;;  %v1885_v41 = vadd.f32 %v3862_v32, %v1884_v26  ;;  %v4627_v31 = vpop.f32.mrb[35].mxu0  ;;  %v1690_v42 = vmax.f32 %v1684_v34, 0.0  ;;  %v3938_v34 = vld [vmem:[%s6105_s2 + $0xb] ss:$0 sm:$0xff] }
 0x472   :  { %v1691_v43 = vmax.f32 %v1687_v39, 0.0  ;;  %v1889_v44 = vmax.f32 %v1885_v41, 0.0 }
 0x474   :  { %v1692_v46 = vpack.c.bf16 %v1691_v43, %v1690_v42  ;;  %v1890_v48 = vpack.c.bf16 %v1889_v44, %v1888_v29 }
 0x476   :  { %4617 = vmatmul.mubr.bf16.vlgmr.msra.gmra.mrb[36].mxu1 %v1692_v46  ;;  %4645 = vmatmul.mubr.bf16.vlgmr.msra.gmra.mrb[36].mxu0 %v1890_v48  ;;  %v4951_v46 = vld [vmem:[%s6102_s1 + $0xc0] sm:$0xff]   ;;  %v4952_v48 = vld [vmem:[%s6102_s1 + $0xd0] sm:$0xff]  }
 0x477   :  { %4649 = vmatpush3.bf16.msra.mxu1 %v4929_v45  ;;  %4677 = vmatpush3.bf16.msra.mxu0 %v4930_v47 }
 0x478   :  { %4650 = vmatprep.subr.bf16.mxu1 %v5035_v0  ;;  %4678 = vmatprep.subr.bf16.mxu0 %v5035_v0 }
 0x479   :  { %4652 = vmatprep.mubr.msk.bf16.mxu1 %vm5036_vm0, %v5035_v0  ;;  %4680 = vmatprep.mubr.msk.bf16.mxu0 %vm5036_vm0, %v5035_v0 }
 0x47b   :  { %4651 = vmatpush3.bf16.msra.mxu1 %v4931_v49  ;;  %4679 = vmatpush3.bf16.msra.mxu0 %v4932_v50  ;;  %v4953_v50 = vld [vmem:[%s6102_s1 + $0xc8] sm:$0xff]  }
 0x47c   :  { %4656 = vmatprep.subr.bf16.mxu1 %v5035_v0  ;;  %4684 = vmatprep.subr.bf16.mxu0 %v5035_v0 }
 0x47e   :  { %4653 = vmatmul.mubr.msk.bf16.vlgmr.msra.gmra.mrb[40].mxu1 %vm63_vm1, %v4933_v51  ;;  %4681 = vmatmul.mubr.msk.bf16.vlgmr.msra.gmra.mrb[40].mxu0 %vm63_vm1, %v4934_v52  ;;  %v4954_v51 = vld [vmem:[%s6102_s1 + $0xd8] sm:$0xff]   ;;  %v4955_v52 = vld [vmem:[%s6103_s0 + $0x60] sm:$0xff]  }
 0x47f   :  { %4657 = vmatpush3.bf16.msra.mxu1 %v4935_v53  ;;  %4685 = vmatpush3.bf16.msra.mxu0 %v4936_v54  ;;  %v4956_v53 = vld [vmem:[%s6103_s0 + $0x68] sm:$0xff]   ;;  %v4957_v54 = vld [vmem:[%s6104_s3 + $0x300] sm:$0xff]  }
 0x480   :  { %4658 = vmatprep.subr.bf16.mxu1 %v5035_v0  ;;  %4686 = vmatprep.subr.bf16.mxu0 %v5035_v0 }
 0x481   :  { %4672 = vmatprep.mubr.msk.bf16.mxu1 %vm5036_vm0, %v5035_v0  ;;  %4700 = vmatprep.mubr.msk.bf16.mxu0 %vm5036_vm0, %v5035_v0 }
 0x483   :  { %4659 = vmatpush3.bf16.msra.mxu1 %v4937_v55  ;;  %4687 = vmatpush3.bf16.msra.mxu0 %v4938_v56  ;;  %v4958_v55 = vld [vmem:[%s6104_s3 + $0x340] sm:$0xff]   ;;  %v4959_v56 = vld [vmem:[%s6104_s3 + $0x308] sm:$0xff]  }
 0x484   :  { %4660 = vmatprep.subr.bf16.mxu1 %v5035_v0  ;;  %4688 = vmatprep.subr.bf16.mxu0 %v5035_v0 }
 0x487   :  { %4661 = vmatpush3.bf16.msra.mxu1 %v4939_v57  ;;  %4689 = vmatpush3.bf16.msra.mxu0 %v4940_v58  ;;  %v4960_v57 = vld [vmem:[%s6104_s3 + $0x348] sm:$0xff]   ;;  %v4961_v58 = vld [vmem:[%s6104_s3 + $0x310] sm:$0xff]  }
 0x488   :  { %4662 = vmatprep.subr.bf16.mxu1 %v5035_v0  ;;  %4690 = vmatprep.subr.bf16.mxu0 %v5035_v0 }
 0x48b   :  { %4663 = vmatpush3.bf16.msra.mxu1 %v4941_v59  ;;  %4691 = vmatpush3.bf16.msra.mxu0 %v4942_v60  ;;  %v4962_v59 = vld [vmem:[%s6104_s3 + $0x350] sm:$0xff]   ;;  %v4963_v60 = vld [vmem:[%s6104_s3 + $0x318] sm:$0xff]  }
 0x48c   :  { %4664 = vmatprep.subr.bf16.mxu1 %v5035_v0  ;;  %4692 = vmatprep.subr.bf16.mxu0 %v5035_v0 }
 0x48f   :  { %4665 = vmatpush3.bf16.msra.mxu1 %v4943_v61  ;;  %4693 = vmatpush3.bf16.msra.mxu0 %v4944_v62  ;;  %v4964_v61 = vld [vmem:[%s6104_s3 + $0x358] sm:$0xff]   ;;  %v4965_v62 = vld [vmem:[%s6104_s3 + $0x320] sm:$0xff]  }
 0x490   :  { %4666 = vmatprep.subr.bf16.mxu1 %v5035_v0  ;;  %4694 = vmatprep.subr.bf16.mxu0 %v5035_v0 }
 0x493   :  { %4667 = vmatpush3.bf16.msra.mxu1 %v4945_v63  ;;  %4695 = vmatpush3.bf16.msra.mxu0 %v4946_v1  ;;  %v4966_v63 = vld [vmem:[%s6104_s3 + $0x360] sm:$0xff]   ;;  %v4967_v1 = vld [vmem:[%s6104_s3 + $0x328] sm:$0xff]  }
 0x494   :  { %4668 = vmatprep.subr.bf16.mxu1 %v5035_v0  ;;  %4696 = vmatprep.subr.bf16.mxu0 %v5035_v0 }
 0x497   :  { %4669 = vmatpush3.bf16.msra.mxu1 %v4947_v2  ;;  %4697 = vmatpush3.bf16.msra.mxu0 %v4948_v3  ;;  %v4968_v2 = vld [vmem:[%s6104_s3 + $0x368] sm:$0xff]   ;;  %v4969_v3 = vld [vmem:[%s6104_s3 + $0x330] sm:$0xff]  }
 0x498   :  { %4670 = vmatprep.subr.bf16.mxu1 %v5035_v0  ;;  %4698 = vmatprep.subr.bf16.mxu0 %v5035_v0 }
 0x49b   :  { %4671 = vmatpush3.bf16.msra.mxu1 %v4949_v4  ;;  %4699 = vmatpush3.bf16.msra.mxu0 %v4950_v5  ;;  %v4970_v4 = vld [vmem:[%s6104_s3 + $0x370] sm:$0xff]   ;;  %v4971_v5 = vld [vmem:[%s6104_s3 + $0x338] sm:$0xff]  }
 0x49c   :  { %4704 = vmatprep.subr.bf16.mxu1 %v5035_v0  ;;  %4732 = vmatprep.subr.bf16.mxu0 %v5035_v0 }
 0x549   :  { %v1800_v8 = vpop.f32.mrb[36].mxu1  ;;  %v1998_v10 = vpop.f32.mrb[36].mxu0 }
 0x54a   :  { %v1801_v9 = vadd.f32 %v3846_v6, %v1800_v8  ;;  %v4618_v11 = vpop.f32.mrb[37].mxu1  ;;  %v1999_v12 = vadd.f32 %v3884_v7, %v1998_v10  ;;  %v4646_v13 = vpop.f32.mrb[37].mxu0  ;;  %v3960_v8 = vld [vmem:[%s6106_s4 + $0xb] ss:$0 sm:$0xff] }
 0x54b   :  { %v1803_v14 = vpop.f32.mrb[38].mxu1  ;;  %v2001_v17 = vpop.f32.mrb[38].mxu0 }
 0x54c   :  { %v1807_v15 = vmax.f32 %v1801_v9, 0.0  ;;  %v1804_v16 = vadd.f32 %v3846_v6, %v1803_v14  ;;  %v4619_v18 = vpop.f32.mrb[39].mxu1  ;;  %v2002_v19 = vadd.f32 %v3884_v7, %v2001_v17  ;;  %v4647_v20 = vpop.f32.mrb[39].mxu0  ;;  %v2005_v24 = vmax.f32 %v1999_v12, 0.0  ;;  %v4972_v6 = vld [vmem:[%s6104_s3 + $0x378] sm:$0xff]  }
 0x54d   :  { %v3922_v7 = vld [vmem:[%s6106_s4 + $0xa] ss:$0 sm:$0xff] }
 0x54e   :  { %v1809_v22 = vmax.f32 %v5638_v28, %v1807_v15  ;;  %v1808_v27 = vmax.f32 %v1804_v16, 0.0  ;;  %v2006_v23 = vmax.f32 %v2002_v19, 0.0 }
 0x550   :  { %v5752_v21 = vmax.f32 %v1809_v22, %v2005_v24  ;;  %v1810_v32 = vmax.f32 %v5644_v33, %v1808_v27 }
 0x551   :  { %v2079_v25 = vpop.f32.mrb[40].mxu1  ;;  %v2277_v28 = vpop.f32.mrb[40].mxu0 }
 0x552   :  { %v5758_v35 = vmax.f32 %v1810_v32, %v2006_v23  ;;  %v2080_v36 = vadd.f32 %v3900_v30, %v2079_v25  ;;  %v4654_v37 = vpop.f32.mrb[41].mxu1  ;;  %v2278_v38 = vadd.f32 %v3938_v34, %v2277_v28  ;;  %v4682_v39 = vpop.f32.mrb[41].mxu0  ;;  %v3976_v32 = vld [vmem:[%s6105_s2 + $0xc] ss:$0 sm:$0xff] }
 0x553   :  { %v2082_v26 = vpop.f32.mrb[42].mxu1  ;;  %v2280_v29 = vpop.f32.mrb[42].mxu0 }
 0x554   :  { %v2083_v40 = vadd.f32 %v3900_v30, %v2082_v26  ;;  %v4655_v41 = vpop.f32.mrb[43].mxu1  ;;  %v2284_v31 = vmax.f32 %v2278_v38, 0.0  ;;  %v2281_v42 = vadd.f32 %v3938_v34, %v2280_v29  ;;  %v4683_v33 = vpop.f32.mrb[43].mxu0  ;;  %v2086_v43 = vmax.f32 %v2080_v36, 0.0  ;;  %v4014_v36 = vld [vmem:[%s6105_s2 + $0xd] ss:$0 sm:$0xff] }
 0x556   :  { %v2087_v44 = vmax.f32 %v2083_v40, 0.0  ;;  %v2285_v45 = vmax.f32 %v2281_v42, 0.0 }
 0x558   :  { %v2088_v47 = vpack.c.bf16 %v2087_v44, %v2086_v43  ;;  %v2286_v49 = vpack.c.bf16 %v2285_v45, %v2284_v31 }
 0x55a   :  { %4673 = vmatmul.mubr.bf16.vlgmr.msra.gmra.mrb[44].mxu1 %v2088_v47  ;;  %4701 = vmatmul.mubr.bf16.vlgmr.msra.gmra.mrb[44].mxu0 %v2286_v49  ;;  %v4973_v47 = vld [vmem:[%s6102_s1 + $0xe0] sm:$0xff]   ;;  %v4974_v49 = vld [vmem:[%s6102_s1 + $0xf0] sm:$0xff]  }
 0x55b   :  { %4705 = vmatpush3.bf16.msra.mxu1 %v4951_v46  ;;  %4733 = vmatpush3.bf16.msra.mxu0 %v4952_v48 }
 0x55c   :  { %4706 = vmatprep.subr.bf16.mxu1 %v5035_v0  ;;  %4734 = vmatprep.subr.bf16.mxu0 %v5035_v0 }
 0x55d   :  { %4708 = vmatprep.mubr.msk.bf16.mxu1 %vm5036_vm0, %v5035_v0  ;;  %4736 = vmatprep.mubr.msk.bf16.mxu0 %vm5036_vm0, %v5035_v0 }
 0x55f   :  { %4707 = vmatpush3.bf16.msra.mxu1 %v4953_v50  ;;  %4735 = vmatpush3.bf16.msra.mxu0 %v4954_v51  ;;  %v4975_v51 = vld [vmem:[%s6102_s1 + $0xe8] sm:$0xff]  }
 0x560   :  { %4712 = vmatprep.subr.bf16.mxu1 %v5035_v0  ;;  %4740 = vmatprep.subr.bf16.mxu0 %v5035_v0 }
 0x562   :  { %4709 = vmatmul.mubr.msk.bf16.vlgmr.msra.gmra.mrb[48].mxu1 %vm63_vm1, %v4955_v52  ;;  %4737 = vmatmul.mubr.msk.bf16.vlgmr.msra.gmra.mrb[48].mxu0 %vm63_vm1, %v4956_v53  ;;  %v4976_v52 = vld [vmem:[%s6102_s1 + $0xf8] sm:$0xff]   ;;  %v4977_v53 = vld [vmem:[%s6103_s0 + $0x70] sm:$0xff]  }
 0x563   :  { %4713 = vmatpush3.bf16.msra.mxu1 %v4957_v54  ;;  %4741 = vmatpush3.bf16.msra.mxu0 %v4958_v55  ;;  %v4978_v54 = vld [vmem:[%s6103_s0 + $0x78] sm:$0xff]   ;;  %v4979_v55 = vld [vmem:[%s6104_s3 + $0x380] sm:$0xff]  }
 0x564   :  { %4714 = vmatprep.subr.bf16.mxu1 %v5035_v0  ;;  %4742 = vmatprep.subr.bf16.mxu0 %v5035_v0 }
 0x565   :  { %4728 = vmatprep.mubr.msk.bf16.mxu1 %vm5036_vm0, %v5035_v0  ;;  %4756 = vmatprep.mubr.msk.bf16.mxu0 %vm5036_vm0, %v5035_v0 }
 0x567   :  { %4715 = vmatpush3.bf16.msra.mxu1 %v4959_v56  ;;  %4743 = vmatpush3.bf16.msra.mxu0 %v4960_v57  ;;  %v4980_v56 = vld [vmem:[%s6104_s3 + $0x3c0] sm:$0xff]   ;;  %v4981_v57 = vld [vmem:[%s6104_s3 + $0x388] sm:$0xff]  }
 0x568   :  { %4716 = vmatprep.subr.bf16.mxu1 %v5035_v0  ;;  %4744 = vmatprep.subr.bf16.mxu0 %v5035_v0 }
 0x56b   :  { %4717 = vmatpush3.bf16.msra.mxu1 %v4961_v58  ;;  %4745 = vmatpush3.bf16.msra.mxu0 %v4962_v59  ;;  %v4982_v58 = vld [vmem:[%s6104_s3 + $0x3c8] sm:$0xff]   ;;  %v4983_v59 = vld [vmem:[%s6104_s3 + $0x390] sm:$0xff]  }
 0x56c   :  { %4718 = vmatprep.subr.bf16.mxu1 %v5035_v0  ;;  %4746 = vmatprep.subr.bf16.mxu0 %v5035_v0 }
 0x56f   :  { %4719 = vmatpush3.bf16.msra.mxu1 %v4963_v60  ;;  %4747 = vmatpush3.bf16.msra.mxu0 %v4964_v61  ;;  %v4984_v60 = vld [vmem:[%s6104_s3 + $0x3d0] sm:$0xff]   ;;  %v4985_v61 = vld [vmem:[%s6104_s3 + $0x398] sm:$0xff]  }
 0x570   :  { %4720 = vmatprep.subr.bf16.mxu1 %v5035_v0  ;;  %4748 = vmatprep.subr.bf16.mxu0 %v5035_v0 }
 0x573   :  { %4721 = vmatpush3.bf16.msra.mxu1 %v4965_v62  ;;  %4749 = vmatpush3.bf16.msra.mxu0 %v4966_v63  ;;  %v4986_v62 = vld [vmem:[%s6104_s3 + $0x3d8] sm:$0xff]   ;;  %v4987_v63 = vld [vmem:[%s6104_s3 + $0x3a0] sm:$0xff]  }
 0x574   :  { %4722 = vmatprep.subr.bf16.mxu1 %v5035_v0  ;;  %4750 = vmatprep.subr.bf16.mxu0 %v5035_v0 }
 0x577   :  { %4723 = vmatpush3.bf16.msra.mxu1 %v4967_v1  ;;  %4751 = vmatpush3.bf16.msra.mxu0 %v4968_v2  ;;  %v4988_v1 = vld [vmem:[%s6104_s3 + $0x3e0] sm:$0xff]   ;;  %v4989_v2 = vld [vmem:[%s6104_s3 + $0x3a8] sm:$0xff]  }
 0x578   :  { %4724 = vmatprep.subr.bf16.mxu1 %v5035_v0  ;;  %4752 = vmatprep.subr.bf16.mxu0 %v5035_v0 }
 0x57b   :  { %4725 = vmatpush3.bf16.msra.mxu1 %v4969_v3  ;;  %4753 = vmatpush3.bf16.msra.mxu0 %v4970_v4  ;;  %v4990_v3 = vld [vmem:[%s6104_s3 + $0x3e8] sm:$0xff]   ;;  %v4991_v4 = vld [vmem:[%s6104_s3 + $0x3b0] sm:$0xff]  }
 0x57c   :  { %4726 = vmatprep.subr.bf16.mxu1 %v5035_v0  ;;  %4754 = vmatprep.subr.bf16.mxu0 %v5035_v0 }
 0x57f   :  { %4727 = vmatpush3.bf16.msra.mxu1 %v4971_v5  ;;  %4755 = vmatpush3.bf16.msra.mxu0 %v4972_v6  ;;  %v4992_v5 = vld [vmem:[%s6104_s3 + $0x3f0] sm:$0xff]   ;;  %v4993_v6 = vld [vmem:[%s6104_s3 + $0x3b8] sm:$0xff]  }
 0x580   :  { %4760 = vmatprep.subr.bf16.mxu1 %v5035_v0  ;;  %4788 = vmatprep.subr.bf16.mxu0 %v5035_v0 }
 0x62d   :  { %v2196_v9 = vpop.f32.mrb[44].mxu1  ;;  %v2394_v11 = vpop.f32.mrb[44].mxu0 }
 0x62e   :  { %v2197_v10 = vadd.f32 %v3922_v7, %v2196_v9  ;;  %v4674_v12 = vpop.f32.mrb[45].mxu1  ;;  %v2395_v13 = vadd.f32 %v3960_v8, %v2394_v11  ;;  %v4702_v14 = vpop.f32.mrb[45].mxu0  ;;  %v3998_v9 = vld [vmem:[%s6106_s4 + $0xc] ss:$0 sm:$0xff] }
 0x62f   :  { %v2199_v15 = vpop.f32.mrb[46].mxu1  ;;  %v2397_v18 = vpop.f32.mrb[46].mxu0 }
 0x630   :  { %v2203_v16 = vmax.f32 %v2197_v10, 0.0  ;;  %v2200_v17 = vadd.f32 %v3922_v7, %v2199_v15  ;;  %v4675_v19 = vpop.f32.mrb[47].mxu1  ;;  %v2398_v20 = vadd.f32 %v3960_v8, %v2397_v18  ;;  %v4703_v22 = vpop.f32.mrb[47].mxu0  ;;  %v2401_v27 = vmax.f32 %v2395_v13, 0.0  ;;  %v4994_v7 = vld [vmem:[%s6104_s3 + $0x3f8] sm:$0xff]  }
 0x631   :  { %v4997_v8 = vld [vmem:[%s6107_s5 + $0x4] ss:$8 sps:$4 sm:$0xff]  }
 0x632   :  { %v2205_v24 = vmax.f32 %v5752_v21, %v2203_v16  ;;  %v2204_v30 = vmax.f32 %v2200_v17, 0.0  ;;  %v2402_v25 = vmax.f32 %v2398_v20, 0.0 }
 0x634   :  { %v5866_v23 = vmax.f32 %v2205_v24, %v2401_v27  ;;  %v2206_v34 = vmax.f32 %v5758_v35, %v2204_v30 }
 0x635   :  { %v2475_v28 = vpop.f32.mrb[48].mxu1  ;;  %v2673_v21 = vpop.f32.mrb[48].mxu0 }
 0x636   :  { %v5872_v37 = vmax.f32 %v2206_v34, %v2402_v25  ;;  %v2476_v38 = vadd.f32 %v3976_v32, %v2475_v28  ;;  %v4710_v39 = vpop.f32.mrb[49].mxu1  ;;  %v2674_v26 = vadd.f32 %v4014_v36, %v2673_v21  ;;  %v4738_v40 = vpop.f32.mrb[49].mxu0  ;;  %v4052_v34 = vld [vmem:[%s6105_s2 + $0xe] ss:$0 sm:$0xff] }
 0x637   :  { %v2478_v29 = vpop.f32.mrb[50].mxu1  ;;  %v2676_v31 = vpop.f32.mrb[50].mxu0 }
 0x638   :  { %v2479_v41 = vadd.f32 %v3976_v32, %v2478_v29  ;;  %v4711_v42 = vpop.f32.mrb[51].mxu1  ;;  %v2680_v33 = vmax.f32 %v2674_v26, 0.0  ;;  %v2677_v43 = vadd.f32 %v4014_v36, %v2676_v31  ;;  %v4739_v35 = vpop.f32.mrb[51].mxu0  ;;  %v2482_v44 = vmax.f32 %v2476_v38, 0.0  ;;  %v4090_v38 = vld [vmem:[%s6105_s2 + $0xf] ss:$0 sm:$0xff] }
 0x63a   :  { %v2483_v45 = vmax.f32 %v2479_v41, 0.0  ;;  %v2681_v46 = vmax.f32 %v2677_v43, 0.0 }
 0x63c   :  { %v2484_v48 = vpack.c.bf16 %v2483_v45, %v2482_v44  ;;  %v2682_v50 = vpack.c.bf16 %v2681_v46, %v2680_v33 }
 0x63e   :  { %4729 = vmatmul.mubr.bf16.vlgmr.msra.gmra.mrb[52].mxu1 %v2484_v48  ;;  %4757 = vmatmul.mubr.bf16.vlgmr.msra.gmra.mrb[52].mxu0 %v2682_v50  ;;  %v4995_v48 = vld [vmem:[%s6107_s5] ss:$8 sps:$4 sm:$0xff]   ;;  %v5000_v50 = vld [vmem:[%s6107_s5 + $0x14] ss:$8 sps:$4 sm:$0xff]  }
 0x63f   :  { %4761 = vmatpush3.bf16.msra.mxu1 %v4973_v47  ;;  %4789 = vmatpush3.bf16.msra.mxu0 %v4974_v49 }
 0x640   :  { %4762 = vmatprep.subr.bf16.mxu1 %v5035_v0  ;;  %4790 = vmatprep.subr.bf16.mxu0 %v5035_v0 }
 0x641   :  { %4764 = vmatprep.mubr.msk.bf16.mxu1 %vm5036_vm0, %v5035_v0  ;;  %4792 = vmatprep.mubr.msk.bf16.mxu0 %vm5036_vm0, %v5035_v0 }
 0x643   :  { %4763 = vmatpush3.bf16.msra.mxu1 %v4975_v51  ;;  %4791 = vmatpush3.bf16.msra.mxu0 %v4976_v52  ;;  %v4998_v52 = vld [vmem:[%s6107_s5 + $0x10] ss:$8 sps:$4 sm:$0xff]  }
 0x644   :  { %4768 = vmatprep.subr.bf16.mxu1 %v5035_v0  ;;  %4796 = vmatprep.subr.bf16.mxu0 %v5035_v0 }
 0x646   :  { %4765 = vmatmul.mubr.msk.bf16.vlgmr.msra.gmra.mrb[56].mxu1 %vm63_vm1, %v4977_v53  ;;  %4793 = vmatmul.mubr.msk.bf16.vlgmr.msra.gmra.mrb[56].mxu0 %vm63_vm1, %v4978_v54  ;;  %v5003_v53 = vld [vmem:[%s6107_s5 + $0x24] ss:$8 sps:$4 sm:$0xff]   ;;  %v5001_v54 = vld [vmem:[%s6107_s5 + $0x20] ss:$8 sps:$4 sm:$0xff]  }
 0x647   :  { %4769 = vmatpush3.bf16.msra.mxu1 %v4979_v55  ;;  %4797 = vmatpush3.bf16.msra.mxu0 %v4980_v56  ;;  %v5006_v55 = vld [vmem:[%s6107_s5 + $0x34] ss:$8 sps:$4 sm:$0xff]   ;;  %v5004_v56 = vld [vmem:[%s6107_s5 + $0x30] ss:$8 sps:$4 sm:$0xff]  }
 0x648   :  { %4770 = vmatprep.subr.bf16.mxu1 %v5035_v0  ;;  %4798 = vmatprep.subr.bf16.mxu0 %v5035_v0 }
 0x649   :  { %4784 = vmatprep.mubr.msk.bf16.mxu1 %vm5036_vm0, %v5035_v0  ;;  %4812 = vmatprep.mubr.msk.bf16.mxu0 %vm5036_vm0, %v5035_v0 }
 0x64b   :  { %4771 = vmatpush3.bf16.msra.mxu1 %v4981_v57  ;;  %4799 = vmatpush3.bf16.msra.mxu0 %v4982_v58  ;;  %v5009_v57 = vld [vmem:[%s6107_s5 + $0x44] ss:$8 sps:$4 sm:$0xff]   ;;  %v5007_v58 = vld [vmem:[%s6107_s5 + $0x40] ss:$8 sps:$4 sm:$0xff]  }
 0x64c   :  { %4772 = vmatprep.subr.bf16.mxu1 %v5035_v0  ;;  %4800 = vmatprep.subr.bf16.mxu0 %v5035_v0 }
 0x64f   :  { %4773 = vmatpush3.bf16.msra.mxu1 %v4983_v59  ;;  %4801 = vmatpush3.bf16.msra.mxu0 %v4984_v60  ;;  %v5012_v59 = vld [vmem:[%s6107_s5 + $0x54] ss:$8 sps:$4 sm:$0xff]   ;;  %v5010_v60 = vld [vmem:[%s6107_s5 + $0x50] ss:$8 sps:$4 sm:$0xff]  }
 0x650   :  { %4774 = vmatprep.subr.bf16.mxu1 %v5035_v0  ;;  %4802 = vmatprep.subr.bf16.mxu0 %v5035_v0 }
 0x653   :  { %4775 = vmatpush3.bf16.msra.mxu1 %v4985_v61  ;;  %4803 = vmatpush3.bf16.msra.mxu0 %v4986_v62  ;;  %v5015_v61 = vld [vmem:[%s6107_s5 + $0x64] ss:$8 sps:$4 sm:$0xff]   ;;  %v5013_v62 = vld [vmem:[%s6107_s5 + $0x60] ss:$8 sps:$4 sm:$0xff]  }
 0x654   :  { %4776 = vmatprep.subr.bf16.mxu1 %v5035_v0  ;;  %4804 = vmatprep.subr.bf16.mxu0 %v5035_v0 }
 0x657   :  { %4777 = vmatpush3.bf16.msra.mxu1 %v4987_v63  ;;  %4805 = vmatpush3.bf16.msra.mxu0 %v4988_v1  ;;  %v5018_v63 = vld [vmem:[%s6107_s5 + $0x74] ss:$8 sps:$4 sm:$0xff]   ;;  %v5016_v1 = vld [vmem:[%s6107_s5 + $0x70] ss:$8 sps:$4 sm:$0xff]  }
 0x658   :  { %4778 = vmatprep.subr.bf16.mxu1 %v5035_v0  ;;  %4806 = vmatprep.subr.bf16.mxu0 %v5035_v0 }
 0x65b   :  { %4779 = vmatpush3.bf16.msra.mxu1 %v4989_v2  ;;  %4807 = vmatpush3.bf16.msra.mxu0 %v4990_v3  ;;  %v5037_v2 = vmov 0   ;;  %v5019_v3 = vld [vmem:[%s6108_s7 + $0x40] sm:$0xff]  }
 0x65c   :  { %4780 = vmatprep.subr.bf16.mxu1 %v5035_v0  ;;  %4808 = vmatprep.subr.bf16.mxu0 %v5035_v0 }
 0x65f   :  { %4781 = vmatpush3.bf16.msra.mxu1 %v4991_v4  ;;  %4809 = vmatpush3.bf16.msra.mxu0 %v4992_v5  ;;  %v5020_v4 = vld [vmem:[%s6108_s7] sm:$0xff]   ;;  %v5021_v5 = vld [vmem:[%s6108_s7 + $0x48] sm:$0xff]  }
 0x660   :  { %4782 = vmatprep.subr.bf16.mxu1 %v5035_v0  ;;  %4810 = vmatprep.subr.bf16.mxu0 %v5035_v0  ;;  %v4036_v0 = vld [vmem:[%s6106_s4 + $0xd] ss:$0 sm:$0xff] }
 0x663   :  { %4783 = vmatpush3.bf16.msra.mxu1 %v4993_v6  ;;  %4811 = vmatpush3.bf16.msra.mxu0 %v4994_v7  ;;  %v5022_v6 = vld [vmem:[%s6108_s7 + $0x8] sm:$0xff]   ;;  %v5023_v7 = vld [vmem:[%s6108_s7 + $0x50] sm:$0xff]  }
 0x664   :  { %3306 = vmatprep.subr.bf16.mxu1 %v4997_v8  ;;  %4346 = vmatprep.subr.bf16.mxu0 %v5019_v3  ;;  %v5024_v8 = vld [vmem:[%s6108_s7 + $0x10] sm:$0xff]  }
 0x711   :  { %v2592_v10 = vpop.f32.mrb[52].mxu1  ;;  %v2790_v12 = vpop.f32.mrb[52].mxu0 }
 0x712   :  { %v2593_v11 = vadd.f32 %v3998_v9, %v2592_v10  ;;  %v4730_v13 = vpop.f32.mrb[53].mxu1  ;;  %v2791_v14 = vadd.f32 %v4036_v0, %v2790_v12  ;;  %v4758_v15 = vpop.f32.mrb[53].mxu0  ;;  %v5027_v10 = vld [vmem:[%s6108_s7 + $0x60] sm:$0xff]   ;;  %v5029_v12 = vld [vmem:[%s6108_s7 + $0x68] sm:$0xff]  }
 0x713   :  { %v2595_v16 = vpop.f32.mrb[54].mxu1  ;;  %v2793_v19 = vpop.f32.mrb[54].mxu0  ;;  %v4074_v13 = vld [vmem:[%s6106_s4 + $0xe] ss:$0 sm:$0xff] }
 0x714   :  { %v2599_v17 = vmax.f32 %v2593_v11, 0.0  ;;  %v2596_v18 = vadd.f32 %v3998_v9, %v2595_v16  ;;  %v4731_v20 = vpop.f32.mrb[55].mxu1  ;;  %v2794_v22 = vadd.f32 %v4036_v0, %v2793_v19  ;;  %v4759_v24 = vpop.f32.mrb[55].mxu0  ;;  %v2797_v30 = vmax.f32 %v2791_v14, 0.0  ;;  %v5025_v9 = vld [vmem:[%s6108_s7 + $0x58] sm:$0xff]   ;;  %v5028_v11 = vld [vmem:[%s6108_s7 + $0x20] sm:$0xff]  }
 0x715   :  { %v5026_v0 = vld [vmem:[%s6108_s7 + $0x18] sm:$0xff]   ;;  %v4112_v14 = vld [vmem:[%s6106_s4 + $0xf] ss:$0 sm:$0xff] }
 0x716   :  { %v2601_v27 = vmax.f32 %v5866_v23, %v2599_v17  ;;  %v2600_v32 = vmax.f32 %v2596_v18, 0.0  ;;  %v2798_v28 = vmax.f32 %v2794_v22, 0.0 }
 0x718   :  { %v5981_v25 = vmax.f32 %v2601_v27, %v2797_v30  ;;  %v2602_v36 = vmax.f32 %v5872_v37, %v2600_v32 }
 0x719   :  { %v2871_v21 = vpop.f32.mrb[56].mxu1  ;;  %v3069_v23 = vpop.f32.mrb[56].mxu0 }
 0x71a   :  { %v5987_v39 = vmax.f32 %v2602_v36, %v2798_v28  ;;  %v2872_v26 = vadd.f32 %v4052_v34, %v2871_v21  ;;  %v4766_v40 = vpop.f32.mrb[57].mxu1  ;;  %v3070_v29 = vadd.f32 %v4090_v38, %v3069_v23  ;;  %v4794_v41 = vpop.f32.mrb[57].mxu0 }
 0x71b   :  { %v2874_v31 = vpop.f32.mrb[58].mxu1  ;;  %v3072_v33 = vpop.f32.mrb[58].mxu0 }
 0x71c   :  { %v2875_v42 = vadd.f32 %v4052_v34, %v2874_v31  ;;  %v4767_v43 = vpop.f32.mrb[59].mxu1  ;;  %v3076_v35 = vmax.f32 %v3070_v29, 0.0  ;;  %v3073_v44 = vadd.f32 %v4090_v38, %v3072_v33  ;;  %v4795_v37 = vpop.f32.mrb[59].mxu0  ;;  %v2878_v45 = vmax.f32 %v2872_v26, 0.0  ;;  %v5030_v31 = vld [vmem:[%s6108_s7 + $0x28] sm:$0xff]   ;;  %v5034_v33 = vld [vmem:[%s6108_s7 + $0x38] sm:$0xff]  }
 0x71d   :  { %v3216_v43 = vlaneseq  ;;  %v3214_v37 = vld [vmem:[%s6109_s6] sm:$0x3] }
 0x71e   :  { %v2879_v46 = vmax.f32 %v2875_v42, 0.0  ;;  %v3077_v47 = vmax.f32 %v3073_v44, 0.0  ;;  %v5031_v42 = vld [vmem:[%s6108_s7 + $0x70] sm:$0xff]  }
 0x720   :  { %v2880_v49 = vpack.c.bf16 %v2879_v46, %v2878_v45  ;;  %v3078_v51 = vpack.c.bf16 %v3077_v47, %v3076_v35  ;;  %v3217_v35 = vshrl.u32 %v3216_v43, 7 }
 0x722   :  { %4785 = vmatmul.mubr.bf16.vlgmr.msra.gmra.mrb[60].mxu1 %v2880_v49  ;;  %4813 = vmatmul.mubr.bf16.vlgmr.msra.gmra.mrb[60].mxu0 %v3078_v51  ;;  %v3218_v44 = vsub.s32 0, %v3217_v35  ;;  %v3222_v45 = vsub.s32 1, %v3217_v35 }
 0x723   :  { %3307 = vmatpush1.bf16.msra.mxu1 %v4995_v48  ;;  %3338 = vmatprep.mubr.bf16.mxu1 %v5037_v2 }
 0x724   :  { %3308 = vmatprep.subr.bf16.mxu1 %v5000_v50  ;;  %4347 = vmatpush3.bf16.msra.mxu0 %v5020_v4  ;;  %v3219_v46 = vrot.slane %v3214_v37, %v3218_v44  ;;  %v3223_v47 = vrot.slane %v3214_v37, %v3222_v45 }
 0x725   :  { %4348 = vmatprep.subr.bf16.mxu0 %v5021_v5 }
 0x727   :  { %3309 = vmatpush1.bf16.msra.mxu1 %v4998_v52 }
 0x728   :  { %3310 = vmatprep.subr.bf16.mxu1 %v5003_v53  ;;  %4349 = vmatpush3.bf16.msra.mxu0 %v5022_v6 }
 0x729   :  { %4350 = vmatprep.subr.bf16.mxu0 %v5023_v7 }
 0x72b   :  { %3311 = vmatpush1.bf16.msra.mxu1 %v5001_v54 }
 0x72c   :  { %3312 = vmatprep.subr.bf16.mxu1 %v5006_v55  ;;  %4351 = vmatpush3.bf16.msra.mxu0 %v5024_v8 }
 0x72d   :  { %4352 = vmatprep.subr.bf16.mxu0 %v5025_v9 }
 0x72f   :  { %3313 = vmatpush1.bf16.msra.mxu1 %v5004_v56 }
 0x730   :  { %3314 = vmatprep.subr.bf16.mxu1 %v5009_v57  ;;  %4353 = vmatpush3.bf16.msra.mxu0 %v5026_v0 }
 0x731   :  { %4354 = vmatprep.subr.bf16.mxu0 %v5027_v10 }
 0x733   :  { %3315 = vmatpush1.bf16.msra.mxu1 %v5007_v58 }
 0x734   :  { %3316 = vmatprep.subr.bf16.mxu1 %v5012_v59  ;;  %4355 = vmatpush3.bf16.msra.mxu0 %v5028_v11 }
 0x735   :  { %4356 = vmatprep.subr.bf16.mxu0 %v5029_v12 }
 0x737   :  { %3317 = vmatpush1.bf16.msra.mxu1 %v5010_v60 }
 0x738   :  { %3318 = vmatprep.subr.bf16.mxu1 %v5015_v61  ;;  %4357 = vmatpush3.bf16.msra.mxu0 %v5030_v31 }
 0x739   :  { %4358 = vmatprep.subr.bf16.mxu0 %v5031_v42 }
 0x73b   :  { %3319 = vmatpush1.bf16.msra.mxu1 %v5013_v62 }
 0x73c   :  { %3320 = vmatprep.subr.bf16.mxu1 %v5018_v63  ;;  %v4137_v63 = vld [vmem:[%s6110_s8] ss:$0 sm:$0xff] }
 0x73f   :  { %3321 = vmatpush1.bf16.msra.mxu1 %v5016_v1 }
 0x7f5   :  { %v2988_v15 = vpop.f32.mrb[60].mxu1  ;;  %v3186_v17 = vpop.f32.mrb[60].mxu0 }
 0x7f6   :  { %v2989_v16 = vadd.f32 %v4074_v13, %v2988_v15  ;;  %v4786_v18 = vpop.f32.mrb[61].mxu1  ;;  %v3187_v19 = vadd.f32 %v4112_v14, %v3186_v17  ;;  %v4814_v20 = vpop.f32.mrb[61].mxu0 }
 0x7f7   :  { %v2991_v22 = vpop.f32.mrb[62].mxu1  ;;  %v3189_v30 = vpop.f32.mrb[62].mxu0 }
 0x7f8   :  { %v2995_v24 = vmax.f32 %v2989_v16, 0.0  ;;  %v2992_v27 = vadd.f32 %v4074_v13, %v2991_v22  ;;  %v4787_v32 = vpop.f32.mrb[63].mxu1  ;;  %v3190_v34 = vadd.f32 %v4112_v14, %v3189_v30  ;;  %v4815_v36 = vpop.f32.mrb[63].mxu0  ;;  %v3193_v38 = vmax.f32 %v3187_v19, 0.0 }
 0x7fa   :  { %v2997_v28 = vmax.f32 %v5981_v25, %v2995_v24  ;;  %v2996_v21 = vmax.f32 %v2992_v27, 0.0  ;;  %v3194_v40 = vmax.f32 %v3190_v34, 0.0  ;;  %v5032_v25 = vld [vmem:[%s6108_s7 + $0x30] sm:$0xff]  }
 0x7fb   :  { %4359 = vmatpush3.bf16.msra.mxu0 %v5032_v25 }
 0x7fc   :  { %v3195_v26 = vmax.f32 %v2997_v28, %v3193_v38  ;;  %v2998_v23 = vmax.f32 %v5987_v39, %v2996_v21  ;;  %v5033_v39 = vld [vmem:[%s6108_s7 + $0x78] sm:$0xff]  }
 0x7fd   :  { %4360 = vmatprep.subr.bf16.mxu0 %v5033_v39 }
 0x7fe   :  { %v3196_v29 = vmax.f32 %v2998_v23, %v3194_v40 }
 0x7ff   :  { %4361 = vmatpush3.bf16.msra.mxu0 %v5034_v33 }
 0x800   :  { %v3197_v41 = vpack.c.bf16 %v3196_v29, %v3195_v26 }
 0x802   :  { %3339 = vmatmul.mubr.bf16.vlgmr.msra.gmra.mrb[64].mxu1 %v3197_v41 }
 0x8d5   :  { %v3340_v48 = vpop.f32.mrb[64].mxu1 }
 0x8d6   :  { %v3341_v49 = vadd.f32 %v3340_v48, %v3219_v46  ;;  %v3342_v50 = vpop.f32.mrb[65].mxu1 }
 0x8d7   :  { %v3343_v51 = vadd.f32 %v3342_v50, %v3223_v47  ;;  %v3344_v52 = vpop.f32.mrb[66].mxu1 }
 0x8d8   :  { %v3345_v53 = vadd.f32 %v3344_v52, %v3219_v46  ;;  %v3346_v54 = vpop.f32.mrb[67].mxu1  ;;  %v3349_v56 = vmax.f32 %v3341_v49, 0.0 }
 0x8d9   :  { %v3347_v55 = vadd.f32 %v3346_v54, %v3223_v47  ;;  %v3350_v58 = vmax.f32 %v3343_v51, 0.0 }
 0x8da   :  { %v3351_v57 = vmax.f32 %v3345_v53, 0.0 }
 0x8db   :  { %v3352_v59 = vmax.f32 %v3347_v55, 0.0 }
 0x8dc   :  { %v3353_v60 = vpack.c.bf16 %v3351_v57, %v3349_v56 }
 0x8dd   :  { %v3354_v61 = vpack.c.bf16 %v3352_v59, %v3350_v58 }
 0x8df   :  { %3522 = vmatprep.mubr.bf16.mxu0 %v3354_v61 }
 0x8e0   :  { %3523 = vmatmul.mubr.bf16.vlgmr.msra.gmra.mrb[64].mxu0 %v3353_v60 }
 0x9b3   :  { %v4362_v62 = vpop.f32.mrb[64].mxu0 }
 0x9b4   :  { %v4363_v1 = vpop.f32.mrb[65].mxu0 }
 0x9b5   :  { %v4364_v2 = vadd.f32 %v4363_v1, %v4362_v62  ;;  %v4365_v3 = vpop.f32.mrb[66].mxu0 }
 0x9b6   :  { %v4366_v4 = vpop.f32.mrb[67].mxu0 }
 0x9b7   :  { %v3525_v5 = vadd.f32 %v4364_v2, %v4137_v63  ;;  %v4367_v6 = vadd.f32 %v4366_v4, %v4365_v3 }
 0x9b9   :  { %3531 = vst [vmem:[%s6111_s9] sm:$0xff] %v3525_v5  ;;  %v3528_v7 = vadd.f32 %v4367_v6, %v4137_v63 }
 0x9bb   :  { %3532 = vst [vmem:[%s6111_s9 + $0x8] sm:$0xff] %v3528_v7 }

</bundles_post_ra>
